<compile_context>
chip_gen: v6e
topology: v6e:2x2x1
jax: 0.10.0
libtpu: 0.0.40
codegen_flags: <defaults>
</compile_context>

<pallas_src>
import functools
import math

import numpy as np
import jax
import jax.numpy as jnp
from jax import lax
from jax.experimental import pallas as pl
from jax.experimental.pallas import tpu as pltpu

F32 = jnp.float32


# ---------------------------------------------------------------------------
# BlockSpec helpers
# ---------------------------------------------------------------------------
def _fullmap(nd):
    return lambda b, _nd=nd: (0,) * _nd


def _wspec(arr):
    """Full-array (weight) spec: same block every grid step -> fetched once."""
    return pl.BlockSpec(arr.shape, _fullmap(arr.ndim))


def _row(v):
    return v.reshape(1, -1)


def _col(v):
    return v.reshape(-1, 1)


# ---------------------------------------------------------------------------
# Kernel 1: fused two-way transformer stand-in + hyper MLPs + IoU head
# ---------------------------------------------------------------------------
def _twoway_fused_kernel(tok_ref, src_ref, pos_ref,
                         wq, bq, wsp, bsp, wv, bv, wo, bo,
                         whs, bhs, wos, bos,
                         hw1, hb1, hw2, hb2, hw3, hb3,
                         iw1, ib1, iw2, ib2, iw3, ib3,
                         mt_out, srcT_out, hyp_out, iou_out):
    # TODO(synk): the SAM TwoWayTransformer is an injected dependency whose
    # definition is not in the reference; this is a deterministic single-block
    # two-way attention stand-in with the same interface (same math as before).
    C = src_ref.shape[2]
    M = hw1.shape[0]
    scale = 1.0 / math.sqrt(C)

    tok = tok_ref[0].astype(F32)               # (Nt, C)
    src = src_ref[0].astype(F32)               # (P,  C)
    spp = src + pos_ref[0].astype(F32)

    # --- tokens attend to image (packed [K_tok | Q_img] projection of src+pos)
    q1 = jnp.dot(tok, wq[...], preferred_element_type=F32) + bq[...]
    kq = jnp.dot(spp, wsp[...], preferred_element_type=F32) + bsp[...]      # (P, 2C)
    k1, q2 = kq[:, :C], kq[:, C:]
    v1 = jnp.dot(src, wv[...], preferred_element_type=F32) + bv[...]

    s1 = lax.dot_general(q1, k1, (((1,), (1,)), ((), ())),
                         preferred_element_type=F32) * scale
    s1 = s1 - jnp.max(s1, axis=-1, keepdims=True)
    e1 = jnp.exp(s1)
    p1 = e1 * pl.reciprocal(jnp.sum(e1, axis=-1, keepdims=True), approx=True)
    hs = tok + jnp.dot(jnp.dot(p1, v1, preferred_element_type=F32), wo[...],
                       preferred_element_type=F32) + bo[...]

    # --- image attends to tokens (packed [K_img | V_img] projection of hs)
    kv2 = jnp.dot(hs, whs[...], preferred_element_type=F32) + bhs[...]      # (Nt, 2C)
    k2, v2 = kv2[:, :C], kv2[:, C:]
    s2 = lax.dot_general(q2, k2, (((1,), (1,)), ((), ())),
                         preferred_element_type=F32) * scale
    s2 = s2 - jnp.max(s2, axis=-1, keepdims=True)
    e2 = jnp.exp(s2)
    p2 = e2 * pl.reciprocal(jnp.sum(e2, axis=-1, keepdims=True), approx=True)
    src_out = src + jnp.dot(jnp.dot(p2, v2, preferred_element_type=F32), wos[...],
                            preferred_element_type=F32) + bos[...]          # (P, C)

    # channels-first store for downstream kernels / NCHW module output.
    # (transpose done on the MXU via an identity matmul -- always lowers.)
    rid = lax.broadcasted_iota(jnp.int32, (C, C), 0)
    cid = lax.broadcasted_iota(jnp.int32, (C, C), 1)
    eye = (rid == cid).astype(F32)
    srcT_out[0] = lax.dot_general(eye, src_out, (((1,), (1,)), ((), ())),
                                  preferred_element_type=F32)               # (C, P)

    # --- mask tokens + stacked hyper-network MLPs (Linear-ReLU x2 -> Linear)
    mt = hs[1:1 + M, :]                                                     # (M, C)
    mt_out[0] = mt
    rows = []
    for m in range(M):
        t = mt[m:m + 1, :]
        h = jnp.maximum(jnp.dot(t, hw1[m], preferred_element_type=F32) + hb1[m], 0.0)
        h = jnp.maximum(jnp.dot(h, hw2[m], preferred_element_type=F32) + hb2[m], 0.0)
        rows.append(jnp.dot(h, hw3[m], preferred_element_type=F32) + hb3[m])
    hyp_out[0] = jnp.concatenate(rows, axis=0)                              # (M, C/8)

    # --- IoU prediction head on the iou token
    it = hs[0:1, :]
    hi = jnp.maximum(jnp.dot(it, iw1[...], preferred_element_type=F32) + ib1[...], 0.0)
    hi = jnp.maximum(jnp.dot(hi, iw2[...], preferred_element_type=F32) + ib2[...], 0.0)
    iou_out[0] = jnp.dot(hi, iw3[...], preferred_element_type=F32) + ib3[...]


def fused_transformer(prep, tokens, src_cl, pos_cl):
    B, Nt, C = tokens.shape
    P = src_cl.shape[1]
    M = prep["M"]
    C8 = C // 8
    tr, hy, io = prep["tr"], prep["hyper"], prep["iou"]
    weights = [tr["wq"], tr["bq"], tr["wsp"], tr["bsp"], tr["wv"], tr["bv"],
               tr["wo"], tr["bo"], tr["whs"], tr["bhs"], tr["wos"], tr["bos"],
               hy["w1"], hy["b1"], hy["w2"], hy["b2"], hy["w3"], hy["b3"],
               io["w1"], io["b1"], io["w2"], io["b2"], io["w3"], io["b3"]]
    in_specs = [pl.BlockSpec((1, Nt, C), lambda b: (b, 0, 0)),
                pl.BlockSpec((1, P, C), lambda b: (b, 0, 0)),
                pl.BlockSpec((1, P, C), lambda b: (b, 0, 0))]
    in_specs += [_wspec(w) for w in weights]
    out_specs = (pl.BlockSpec((1, M, C), lambda b: (b, 0, 0)),
                 pl.BlockSpec((1, C, P), lambda b: (b, 0, 0)),
                 pl.BlockSpec((1, M, C8), lambda b: (b, 0, 0)),
                 pl.BlockSpec((1, 1, M), lambda b: (b, 0, 0)))
    out_shape = (jax.ShapeDtypeStruct((B, M, C), F32),
                 jax.ShapeDtypeStruct((B, C, P), F32),
                 jax.ShapeDtypeStruct((B, M, C8), F32),
                 jax.ShapeDtypeStruct((B, 1, M), F32))
    mt, src_cf, hyper_in, iou = pl.pallas_call(
        _twoway_fused_kernel,
        grid=(B,),
        in_specs=in_specs,
        out_specs=out_specs,
        out_shape=out_shape,
        compiler_params=pltpu.CompilerParams(dimension_semantics=("parallel",)),
    )(tokens, src_cl, pos_cl, *weights)
    return mt, src_cf, hyper_in, iou.reshape(B, M)


# ---------------------------------------------------------------------------
# Kernel 2: fused output_upscaling + (hyper_in @ upscaled) mask contraction
# ---------------------------------------------------------------------------
def _upscale_mask_kernel(src_ref, hyp_ref, w1T, b1c, lng, lnb, w2T, b2c, masks_ref):
    C4 = lng.shape[0]
    C8 = w2T.shape[0] // 4
    x = src_ref[0].astype(F32)                 # (C, P)  channels x pixels (lane-dense)
    hyp = hyp_ref[0].astype(F32)               # (M, C8)

    # ConvTranspose2d(k=2,s=2): rows ordered (di1, dj1, oc1)
    y1 = jnp.dot(w1T[...], x, preferred_element_type=F32) + b1c[...]        # (4*C4, P)

    for g1 in range(4):                        # g1 = di1*2 + dj1
        slab = y1[g1 * C4:(g1 + 1) * C4, :]    # (C4, P): LN over channels per pixel
        mu = jnp.mean(slab, axis=0, keepdims=True)
        var = jnp.mean((slab - mu) ** 2, axis=0, keepdims=True)
        a = (slab - mu) * lax.rsqrt(var + 1e-6)
        # NOTE: tanh-approx GELU (PyTorch default is erf GELU; diff ~1e-3)
        a = jax.nn.gelu(a * lng[...] + lnb[...], approximate=True)
        # second ConvTranspose2d(k=2,s=2): rows ordered (di2, dj2, oc2)
        s2 = jnp.dot(w2T[...], a, preferred_element_type=F32) + b2c[...]    # (4*C8, P)
        s2 = jax.nn.gelu(s2, approximate=True)
        for g2 in range(4):                    # g2 = di2*2 + dj2
            blk = s2[g2 * C8:(g2 + 1) * C8, :]                              # (C8, P)
            # hyper_in @ upscaled with K=C8=4 done as VPU multiply-accumulates
            acc = hyp[:, 0:1] * blk[0:1, :]
            for c in range(1, C8):
                acc = acc + hyp[:, c:c + 1] * blk[c:c + 1, :]
            masks_ref[0, g1 * 4 + g2, :, :] = acc                           # (M, P)


def fused_upscale_masks(prep, src_cf, hyper_in):
    B, C, P = src_cf.shape
    M = hyper_in.shape[1]
    up = prep["up"]
    weights = [up["w1T"], up["b1c"], up["lng"], up["lnb"], up["w2T"], up["b2c"]]
    in_specs = [pl.BlockSpec((1, C, P), lambda b: (b, 0, 0)),
                pl.BlockSpec((1, M, C // 8), lambda b: (b, 0, 0))]
    in_specs += [_wspec(w) for w in weights]
    return pl.pallas_call(
        _upscale_mask_kernel,
        grid=(B,),
        in_specs=in_specs,
        out_specs=pl.BlockSpec((1, 16, M, P), lambda b: (b, 0, 0, 0)),
        out_shape=jax.ShapeDtypeStruct((B, 16, M, P), F32),
        compiler_params=pltpu.CompilerParams(dimension_semantics=("parallel",)),
    )(src_cf, hyper_in, *weights)


# ---------------------------------------------------------------------------
# Kernel 3: fused DDIM add_noise + diffusion-model stand-in (3x3 conv + t-bias)
# ---------------------------------------------------------------------------
def _diffusion_kernel(src_ref, noise_ref, sab_ref, te_ref, sT_ref, wk_ref, bc_ref,
                      twT_ref, tbc_ref, out_ref):
    # TODO(synk): DiffusionModel(channels_in, kernel_size=3) architecture is not
    # in the reference; stand-in = 3x3 conv + sinusoidal-time-embedding bias.
    C, P = src_ref.shape[1], src_ref.shape[2]
    b = pl.program_id(0)
    sa = sab_ref[b, 0]                                   # DDIM sqrt(alpha_cumprod)
    sb = sab_ref[b, 1]                                   # sqrt(1 - alpha_cumprod)
    xn = sa * src_ref[0].astype(F32) + sb * noise_ref[0].astype(F32)        # add_noise

    acc = jnp.zeros((C, P), F32)
    for k in range(9):                                   # conv3x3 = 9 shifted matmuls
        xs = jnp.dot(xn, sT_ref[k], preferred_element_type=F32)             # (C, P)
        acc = acc + jnp.dot(wk_ref[k], xs, preferred_element_type=F32)
    tb = jnp.dot(twT_ref[...], te_ref[0], preferred_element_type=F32) + tbc_ref[...]
    out_ref[0] = acc + bc_ref[...] + tb


def fused_diffusion(prep, src_cf, noise_cf, sab, temb_col):
    B, C, P = src_cf.shape
    d = prep["diff"]
    weights = [d["shiftT"], d["wk"], d["bc"], d["twT"], d["tbc"]]
    in_specs = [pl.BlockSpec((1, C, P), lambda b: (b, 0, 0)),
                pl.BlockSpec((1, C, P), lambda b: (b, 0, 0)),
                pl.BlockSpec(memory_space=pltpu.MemorySpace.SMEM),   # sa/sb scalars
                pl.BlockSpec((1, C, 1), lambda b: (b, 0, 0))]
    in_specs += [_wspec(w) for w in weights]
    return pl.pallas_call(
        _diffusion_kernel,
        grid=(B,),
        in_specs=in_specs,
        out_specs=pl.BlockSpec((1, C, P), lambda b: (b, 0, 0)),
        out_shape=jax.ShapeDtypeStruct((B, C, P), F32),
        compiler_params=pltpu.CompilerParams(dimension_semantics=("parallel",)),
    )(src_cf, noise_cf, sab, temb_col, *weights)


# ---------------------------------------------------------------------------
# Parameter packing (done once, outside the forward pass)
# ---------------------------------------------------------------------------
def _build_shift_mats(H, W):
    """S_k^T matrices so that (X_cf @ S_k^T) is X spatially shifted by 3x3 tap k."""
    P = H * W
    mats = np.zeros((9, P, P), np.float32)
    for ky in range(3):
        for kx in range(3):
            k = ky * 3 + kx
            for y in range(H):
                for x in range(W):
                    yy, xx = y + ky - 1, x + kx - 1
                    if 0 <= yy < H and 0 <= xx < W:
                        mats[k, yy * W + xx, y * W + x] = 1.0
    return jnp.asarray(mats)


def prepare_params(raw, H, W):
    C = raw["transformer_dim"]
    M = raw["num_mask_tokens"]
    C4, C8 = C // 4, C // 8
    t, up, df = raw["transformer"], raw["upscaling"], raw["diff"]
    hyp, iou = raw["hyper_mlps"], raw["iou_head"]
    return {
        "C": C, "M": M,
        "iou_token": raw["iou_token"], "mask_tokens": raw["mask_tokens"],
        "tr": dict(
            wq=t["t_wq"], bq=_row(t["t_bq"]),
            wsp=jnp.concatenate([t["t_wk"], t["s_wq"]], axis=1),
            bsp=_row(jnp.concatenate([t["t_bk"], t["s_bq"]])),
            wv=t["t_wv"], bv=_row(t["t_bv"]),
            wo=t["t_wo"], bo=_row(t["t_bo"]),
            whs=jnp.concatenate([t["s_wk"], t["s_wv"]], axis=1),
            bhs=_row(jnp.concatenate([t["s_bk"], t["s_bv"]])),
            wos=t["s_wo"], bos=_row(t["s_bo"]),
        ),
        "hyper": dict(
            w1=jnp.stack([hyp[m][0][0] for m in range(M)]),
            b1=jnp.stack([hyp[m][0][1] for m in range(M)])[:, None, :],
            w2=jnp.stack([hyp[m][1][0] for m in range(M)]),
            b2=jnp.stack([hyp[m][1][1] for m in range(M)])[:, None, :],
            w3=jnp.stack([hyp[m][2][0] for m in range(M)]),
            b3=jnp.stack([hyp[m][2][1] for m in range(M)])[:, None, :],
        ),
        "iou": dict(
            w1=iou[0][0], b1=_row(iou[0][1]),
            w2=iou[1][0], b2=_row(iou[1][1]),
            w3=iou[2][0], b3=_row(iou[2][1]),
        ),
        "up": dict(
            w1T=jnp.transpose(up["up1_w"], (2, 3, 1, 0)).reshape(4 * C4, C),
            b1c=_col(jnp.tile(up["up1_b"], 4)),
            lng=_col(up["ln_g"]), lnb=_col(up["ln_b"]),
            w2T=jnp.transpose(up["up2_w"], (2, 3, 1, 0)).reshape(4 * C8, C4),
            b2c=_col(jnp.tile(up["up2_b"], 4)),
        ),
        "diff": dict(
            wk=jnp.transpose(df["conv_w"], (2, 3, 0, 1)).reshape(9, C, C),
            bc=_col(df["conv_b"]),
            twT=df["time_w"].T, tbc=_col(df["time_b"]),
            shiftT=_build_shift_mats(H, W),
        ),
    }


# ---------------------------------------------------------------------------
# MaskDecoderDiff forward (clear=True path)
# ---------------------------------------------------------------------------
def predict_masks(prep, image_embeddings, image_pe, sparse_prompt_embeddings,
                  dense_prompt_embeddings, rng, clear=True):
    if not clear:
        # TODO(synk): clear=False path needs DDIMPipeline sampling, TokenBlock and
        # robust_mlp whose definitions are not in the reference; not implemented.
        raise NotImplementedError("clear=False path not implemented")

    B = sparse_prompt_embeddings.shape[0]
    C, M = prep["C"], prep["M"]
    _, _, H, W = image_embeddings.shape
    P = H * W

    output_tokens = jnp.concatenate([prep["iou_token"], prep["mask_tokens"]], axis=0)
    output_tokens = jnp.broadcast_to(output_tokens[None], (B,) + output_tokens.shape)
    tokens = jnp.concatenate([output_tokens, sparse_prompt_embeddings], axis=1)

    src_nchw = jnp.repeat(image_embeddings, B, axis=0) + dense_prompt_embeddings
    pos_nchw = jnp.repeat(image_pe, B, axis=0)
    # single boundary NCHW -> channels-last conversion; downstream layout is fixed.
    src_cl = jnp.transpose(src_nchw, (0, 2, 3, 1)).reshape(B, P, C)
    pos_cl = jnp.transpose(pos_nchw, (0, 2, 3, 1)).reshape(B, P, C)

    # Kernel 1: transformer + hyper MLPs + iou head.
    mask_tokens_out, src_cf, hyper_in, iou_pred = fused_transformer(
        prep, tokens, src_cl, pos_cl)
    src_img = src_cf.reshape(B, C, H, W)                                    # NCHW out

    # Kernel 2: upscaling chain + mask contraction (blocked pixel order).
    masks_blk = fused_upscale_masks(prep, src_cf, hyper_in)                 # (B,16,M,P)
    masks = (masks_blk.reshape(B, 2, 2, 2, 2, M, H, W)
             .transpose(0, 5, 6, 1, 3, 7, 2, 4)
             .reshape(B, M, 4 * H, 4 * W))

    # Kernel 3: DDIM add_noise + diffusion-model stand-in (fused).
    k1, k2 = jax.random.split(rng)
    noise = jax.random.normal(k1, (B, C, H, W), dtype=F32)
    timesteps = jax.random.randint(k2, (B,), 0, 1000)
    betas = jnp.linspace(1e-4, 0.02, 1000, dtype=F32)       # DDIM linear schedule
    ac = jnp.cumprod(1.0 - betas)
    sab = jnp.stack([jnp.sqrt(ac[timesteps]), jnp.sqrt(1.0 - ac[timesteps])], axis=1)
    half = C // 2
    freqs = jnp.exp(-jnp.log(10000.0) * jnp.arange(half, dtype=F32) / half)
    ang = timesteps.astype(F32)[:, None] * freqs[None, :]
    temb = jnp.concatenate([jnp.sin(ang), jnp.cos(ang)], axis=-1)[:, :, None]   # (B,C,1)

    noise_pred = fused_diffusion(
        prep, src_cf, noise.reshape(B, C, P), sab, temb).reshape(B, C, H, W)

    robust_token = mask_tokens_out
    return masks, iou_pred, src_img, robust_token, noise_pred, noise


def mask_decoder_forward(prep, image_embeddings, image_pe, sparse_prompt_embeddings,
                         dense_prompt_embeddings, multimask_output, encoder_features,
                         robust_token_only=False, clear=True, rng=None):
    # early_features is computed in the reference but never used downstream.
    _early_features = jnp.transpose(encoder_features[0], (0, 3, 1, 2))
    masks, iou_pred, ups_robust, robust_token, noise_pred, noise = predict_masks(
        prep, image_embeddings, image_pe, sparse_prompt_embeddings,
        dense_prompt_embeddings, rng, clear=clear)
    if multimask_output:
        masks = masks[:, 1:, :, :]
        iou_pred = iou_pred[:, 1:]
    else:
        masks = masks[:, 0:1, :, :]
        iou_pred = iou_pred[:, 0:1]
    return masks, iou_pred, ups_robust, robust_token, noise, noise_pred


# ---------------------------------------------------------------------------
# Deterministic parameter init (PyTorch layouts, packed once by prepare_params)
# ---------------------------------------------------------------------------
def init_params(key, transformer_dim=32, num_multimask_outputs=3, iou_head_hidden_dim=32):
    C = transformer_dim
    M = num_multimask_outputs + 1
    keys = iter(jax.random.split(key, 64))

    def rnd(shape, scale=0.05):
        return (scale * jax.random.normal(next(keys), shape, dtype=F32)).astype(F32)

    def lin(din, dout):
        return (rnd((din, dout)), rnd((dout,)))

    params = {
        "transformer_dim": C,
        "num_mask_tokens": M,
        "iou_token": rnd((1, C)),
        "mask_tokens": rnd((M, C)),
        "upscaling": {
            "up1_w": rnd((C, C // 4, 2, 2)), "up1_b": rnd((C // 4,)),
            "ln_g": jnp.ones((C // 4,), F32), "ln_b": jnp.zeros((C // 4,), F32),
            "up2_w": rnd((C // 4, C // 8, 2, 2)), "up2_b": rnd((C // 8,)),
        },
        "hyper_mlps": [[lin(C, C), lin(C, C), lin(C, C // 8)] for _ in range(M)],
        "iou_head": [lin(C, iou_head_hidden_dim),
                     lin(iou_head_hidden_dim, iou_head_hidden_dim),
                     lin(iou_head_hidden_dim, M)],
        "transformer": {},
        "diff": {
            "conv_w": rnd((C, C, 3, 3)), "conv_b": rnd((C,)),
            "time_w": rnd((C, C)), "time_b": rnd((C,)),
        },
    }
    for pre in ("t", "s"):
        for nm in ("q", "k", "v", "o"):
            w, b = lin(C, C)
            params["transformer"][f"{pre}_w{nm}"] = w
            params["transformer"][f"{pre}_b{nm}"] = b
    return params


# ---------------------------------------------------------------------------
if __name__ == "__main__":
    key = jax.random.PRNGKey(0)
    C, H, W = 32, 8, 8
    B, N_SPARSE = 2, 2

    kp, k1, k2, k3, k4, k5, krng = jax.random.split(key, 7)
    raw_params = init_params(kp, transformer_dim=C)
    prep = prepare_params(raw_params, H, W)

    image_embeddings = jax.random.normal(k1, (1, C, H, W), dtype=F32)
    image_pe = jax.random.normal(k2, (1, C, H, W), dtype=F32)
    sparse_prompt_embeddings = jax.random.normal(k3, (B, N_SPARSE, C), dtype=F32)
    dense_prompt_embeddings = jax.random.normal(k4, (B, C, H, W), dtype=F32)
    encoder_features = [jax.random.normal(k5, (B, H, W, C), dtype=F32)]

    outs = mask_decoder_forward(
        prep, image_embeddings, image_pe, sparse_prompt_embeddings,
        dense_prompt_embeddings, multimask_output=True,
        encoder_features=encoder_features, clear=True, rng=krng)
    outs = jax.block_until_ready(outs)

    masks, iou_pred, ups_robust, robust_token, noise, noise_pred = outs
    assert masks.shape == (B, 3, 4 * H, 4 * W)
    assert iou_pred.shape == (B, 3)
    assert ups_robust.shape == (B, C, H, W)
    assert robust_token.shape == (B, 4, C)
    assert noise.shape == (B, C, H, W) and noise_pred.shape == (B, C, H, W)
    print("KERNEL_OK")
</pallas_src>

<mosaic_0001>
module attributes {stable_mosaic.version = 11 : i64} {
  func.func @_twoway_fused_kernel(%arg0: i32, %arg1: memref<1x7x32xf32, #tpu.memory_space<vmem>>, %arg2: memref<1x64x32xf32, #tpu.memory_space<vmem>>, %arg3: memref<1x64x32xf32, #tpu.memory_space<vmem>>, %arg4: memref<32x32xf32, #tpu.memory_space<vmem>>, %arg5: memref<1x32xf32, #tpu.memory_space<vmem>>, %arg6: memref<32x64xf32, #tpu.memory_space<vmem>>, %arg7: memref<1x64xf32, #tpu.memory_space<vmem>>, %arg8: memref<32x32xf32, #tpu.memory_space<vmem>>, %arg9: memref<1x32xf32, #tpu.memory_space<vmem>>, %arg10: memref<32x32xf32, #tpu.memory_space<vmem>>, %arg11: memref<1x32xf32, #tpu.memory_space<vmem>>, %arg12: memref<32x64xf32, #tpu.memory_space<vmem>>, %arg13: memref<1x64xf32, #tpu.memory_space<vmem>>, %arg14: memref<32x32xf32, #tpu.memory_space<vmem>>, %arg15: memref<1x32xf32, #tpu.memory_space<vmem>>, %arg16: memref<4x32x32xf32, #tpu.memory_space<vmem>>, %arg17: memref<4x1x32xf32, #tpu.memory_space<vmem>>, %arg18: memref<4x32x32xf32, #tpu.memory_space<vmem>>, %arg19: memref<4x1x32xf32, #tpu.memory_space<vmem>>, %arg20: memref<4x32x4xf32, #tpu.memory_space<vmem>>, %arg21: memref<4x1x4xf32, #tpu.memory_space<vmem>>, %arg22: memref<32x32xf32, #tpu.memory_space<vmem>>, %arg23: memref<1x32xf32, #tpu.memory_space<vmem>>, %arg24: memref<32x32xf32, #tpu.memory_space<vmem>>, %arg25: memref<1x32xf32, #tpu.memory_space<vmem>>, %arg26: memref<32x4xf32, #tpu.memory_space<vmem>>, %arg27: memref<1x4xf32, #tpu.memory_space<vmem>>, %arg28: memref<1x4x32xf32, #tpu.memory_space<vmem>>, %arg29: memref<1x32x64xf32, #tpu.memory_space<vmem>>, %arg30: memref<1x4x4xf32, #tpu.memory_space<vmem>>, %arg31: memref<1x1x4xf32, #tpu.memory_space<vmem>>) attributes {dimension_semantics = [#tpu.dimension_semantics<parallel>], iteration_bounds = array<i64: 2>, scalar_prefetch = 0 : i64, scratch_operands = 0 : i64, tpu.core_type = #tpu.core_type<tc>, window_params = [{transform_indices = @transform_0, window_bounds = array<i64: 1, 7, 32>}, {transform_indices = @transform_1, window_bounds = array<i64: 1, 64, 32>}, {transform_indices = @transform_2, window_bounds = array<i64: 1, 64, 32>}, {pipeline_mode = #tpu.pipeline_mode<synchronous>, transform_indices = @transform_3, window_bounds = array<i64: 32, 32>}, {pipeline_mode = #tpu.pipeline_mode<synchronous>, transform_indices = @transform_4, window_bounds = array<i64: 1, 32>}, {pipeline_mode = #tpu.pipeline_mode<synchronous>, transform_indices = @transform_5, window_bounds = array<i64: 32, 64>}, {pipeline_mode = #tpu.pipeline_mode<synchronous>, transform_indices = @transform_6, window_bounds = array<i64: 1, 64>}, {pipeline_mode = #tpu.pipeline_mode<synchronous>, transform_indices = @transform_7, window_bounds = array<i64: 32, 32>}, {pipeline_mode = #tpu.pipeline_mode<synchronous>, transform_indices = @transform_8, window_bounds = array<i64: 1, 32>}, {pipeline_mode = #tpu.pipeline_mode<synchronous>, transform_indices = @transform_9, window_bounds = array<i64: 32, 32>}, {pipeline_mode = #tpu.pipeline_mode<synchronous>, transform_indices = @transform_10, window_bounds = array<i64: 1, 32>}, {pipeline_mode = #tpu.pipeline_mode<synchronous>, transform_indices = @transform_11, window_bounds = array<i64: 32, 64>}, {pipeline_mode = #tpu.pipeline_mode<synchronous>, transform_indices = @transform_12, window_bounds = array<i64: 1, 64>}, {pipeline_mode = #tpu.pipeline_mode<synchronous>, transform_indices = @transform_13, window_bounds = array<i64: 32, 32>}, {pipeline_mode = #tpu.pipeline_mode<synchronous>, transform_indices = @transform_14, window_bounds = array<i64: 1, 32>}, {pipeline_mode = #tpu.pipeline_mode<synchronous>, transform_indices = @transform_15, window_bounds = array<i64: 4, 32, 32>}, {pipeline_mode = #tpu.pipeline_mode<synchronous>, transform_indices = @transform_16, window_bounds = array<i64: 4, 1, 32>}, {pipeline_mode = #tpu.pipeline_mode<synchronous>, transform_indices = @transform_17, window_bounds = array<i64: 4, 32, 32>}, {pipeline_mode = #tpu.pipeline_mode<synchronous>, transform_indices = @transform_18, window_bounds = array<i64: 4, 1, 32>}, {pipeline_mode = #tpu.pipeline_mode<synchronous>, transform_indices = @transform_19, window_bounds = array<i64: 4, 32, 4>}, {pipeline_mode = #tpu.pipeline_mode<synchronous>, transform_indices = @transform_20, window_bounds = array<i64: 4, 1, 4>}, {pipeline_mode = #tpu.pipeline_mode<synchronous>, transform_indices = @transform_21, window_bounds = array<i64: 32, 32>}, {pipeline_mode = #tpu.pipeline_mode<synchronous>, transform_indices = @transform_22, window_bounds = array<i64: 1, 32>}, {pipeline_mode = #tpu.pipeline_mode<synchronous>, transform_indices = @transform_23, window_bounds = array<i64: 32, 32>}, {pipeline_mode = #tpu.pipeline_mode<synchronous>, transform_indices = @transform_24, window_bounds = array<i64: 1, 32>}, {pipeline_mode = #tpu.pipeline_mode<synchronous>, transform_indices = @transform_25, window_bounds = array<i64: 32, 4>}, {pipeline_mode = #tpu.pipeline_mode<synchronous>, transform_indices = @transform_26, window_bounds = array<i64: 1, 4>}, {transform_indices = @transform_27, window_bounds = array<i64: 1, 4, 32>}, {transform_indices = @transform_28, window_bounds = array<i64: 1, 32, 64>}, {transform_indices = @transform_29, window_bounds = array<i64: 1, 4, 4>}, {transform_indices = @transform_30, window_bounds = array<i64: 1, 1, 4>}]} {
    %c0 = arith.constant 0 : index
    %c0_0 = arith.constant 0 : index
    %c0_1 = arith.constant 0 : index
    %0 = vector.load %arg1[%c0, %c0_0, %c0_1] : memref<1x7x32xf32, #tpu.memory_space<vmem>>, vector<1x7x32xf32>
    %1 = vector.shape_cast %0 : vector<1x7x32xf32> to vector<7x32xf32>
    %c0_2 = arith.constant 0 : index
    %c0_3 = arith.constant 0 : index
    %c0_4 = arith.constant 0 : index
    %2 = vector.load %arg2[%c0_2, %c0_3, %c0_4] : memref<1x64x32xf32, #tpu.memory_space<vmem>>, vector<1x64x32xf32>
    %3 = vector.shape_cast %2 : vector<1x64x32xf32> to vector<64x32xf32>
    %c0_5 = arith.constant 0 : index
    %c0_6 = arith.constant 0 : index
    %c0_7 = arith.constant 0 : index
    %4 = vector.load %arg3[%c0_5, %c0_6, %c0_7] : memref<1x64x32xf32, #tpu.memory_space<vmem>>, vector<1x64x32xf32>
    %5 = vector.shape_cast %4 : vector<1x64x32xf32> to vector<64x32xf32>
    %6 = arith.addf %3, %5 : vector<64x32xf32>
    %c0_8 = arith.constant 0 : index
    %c0_9 = arith.constant 0 : index
    %7 = vector.load %arg4[%c0_8, %c0_9] : memref<32x32xf32, #tpu.memory_space<vmem>>, vector<32x32xf32>
    %cst = arith.constant dense<0.000000e+00> : vector<7x32xf32>
    %8 = tpu.matmul %1, %7, %cst {dimension_numbers = #tpu.dot_dimension_numbers<[1], [0], [0], [1], [0, 0, 1, 1], [], []>} : vector<7x32xf32>, vector<32x32xf32>, vector<7x32xf32> -> vector<7x32xf32>
    %c0_10 = arith.constant 0 : index
    %c0_11 = arith.constant 0 : index
    %9 = vector.load %arg5[%c0_10, %c0_11] : memref<1x32xf32, #tpu.memory_space<vmem>>, vector<1x32xf32>
    %10 = vector.broadcast %9 : vector<1x32xf32> to vector<7x32xf32>
    %11 = arith.addf %8, %10 : vector<7x32xf32>
    %c0_12 = arith.constant 0 : index
    %c0_13 = arith.constant 0 : index
    %12 = vector.load %arg6[%c0_12, %c0_13] : memref<32x64xf32, #tpu.memory_space<vmem>>, vector<32x64xf32>
    %cst_14 = arith.constant dense<0.000000e+00> : vector<64x64xf32>
    %13 = tpu.matmul %6, %12, %cst_14 {dimension_numbers = #tpu.dot_dimension_numbers<[1], [0], [0], [1], [0, 0, 1, 1], [], []>} : vector<64x32xf32>, vector<32x64xf32>, vector<64x64xf32> -> vector<64x64xf32>
    %c0_15 = arith.constant 0 : index
    %c0_16 = arith.constant 0 : index
    %14 = vector.load %arg7[%c0_15, %c0_16] : memref<1x64xf32, #tpu.memory_space<vmem>>, vector<1x64xf32>
    %15 = vector.broadcast %14 : vector<1x64xf32> to vector<64x64xf32>
    %16 = arith.addf %13, %15 : vector<64x64xf32>
    %17 = vector.extract_strided_slice %16 {offsets = [0, 0], sizes = [64, 32], strides = [1, 1]} : vector<64x64xf32> to vector<64x32xf32>
    %18 = vector.extract_strided_slice %16 {offsets = [0, 32], sizes = [64, 32], strides = [1, 1]} : vector<64x64xf32> to vector<64x32xf32>
    %c0_17 = arith.constant 0 : index
    %c0_18 = arith.constant 0 : index
    %19 = vector.load %arg8[%c0_17, %c0_18] : memref<32x32xf32, #tpu.memory_space<vmem>>, vector<32x32xf32>
    %cst_19 = arith.constant dense<0.000000e+00> : vector<64x32xf32>
    %20 = tpu.matmul %3, %19, %cst_19 {dimension_numbers = #tpu.dot_dimension_numbers<[1], [0], [0], [1], [0, 0, 1, 1], [], []>} : vector<64x32xf32>, vector<32x32xf32>, vector<64x32xf32> -> vector<64x32xf32>
    %c0_20 = arith.constant 0 : index
    %c0_21 = arith.constant 0 : index
    %21 = vector.load %arg9[%c0_20, %c0_21] : memref<1x32xf32, #tpu.memory_space<vmem>>, vector<1x32xf32>
    %22 = vector.broadcast %21 : vector<1x32xf32> to vector<64x32xf32>
    %23 = arith.addf %20, %22 : vector<64x32xf32>
    %cst_22 = arith.constant dense<0.000000e+00> : vector<7x64xf32>
    %24 = tpu.matmul %11, %17, %cst_22 {dimension_numbers = #tpu.dot_dimension_numbers<[1], [1], [0], [0], [0, 0, 1, 0], [], []>} : vector<7x32xf32>, vector<64x32xf32>, vector<7x64xf32> -> vector<7x64xf32>
    %cst_23 = arith.constant 0.176776692 : f32
    %25 = vector.broadcast %cst_23 : f32 to vector<7x64xf32>
    %26 = arith.mulf %24, %25 : vector<7x64xf32>
    %cst_24 = arith.constant dense<0xFF800000> : vector<7xf32>
    %27 = vector.multi_reduction <maximumf>, %26, %cst_24 [1] : vector<7x64xf32> to vector<7xf32>
    %28 = vector.shape_cast %27 : vector<7xf32> to vector<7x1xf32>
    %29 = vector.broadcast %28 : vector<7x1xf32> to vector<7x64xf32>
    %30 = arith.subf %26, %29 : vector<7x64xf32>
    %31 = math.exp %30 : vector<7x64xf32>
    %cst_25 = arith.constant dense<0.000000e+00> : vector<7xf32>
    %32 = vector.multi_reduction <add>, %31, %cst_25 [1] : vector<7x64xf32> to vector<7xf32>
    %33 = vector.shape_cast %32 : vector<7xf32> to vector<7x1xf32>
    %34 = tpu.reciprocal %33 {approx = true} : vector<7x1xf32> -> vector<7x1xf32>
    %35 = vector.broadcast %34 : vector<7x1xf32> to vector<7x64xf32>
    %36 = arith.mulf %31, %35 : vector<7x64xf32>
    %cst_26 = arith.constant dense<0.000000e+00> : vector<7x32xf32>
    %37 = tpu.matmul %36, %23, %cst_26 {dimension_numbers = #tpu.dot_dimension_numbers<[1], [0], [0], [1], [0, 0, 1, 1], [], []>} : vector<7x64xf32>, vector<64x32xf32>, vector<7x32xf32> -> vector<7x32xf32>
    %c0_27 = arith.constant 0 : index
    %c0_28 = arith.constant 0 : index
    %38 = vector.load %arg10[%c0_27, %c0_28] : memref<32x32xf32, #tpu.memory_space<vmem>>, vector<32x32xf32>
    %cst_29 = arith.constant dense<0.000000e+00> : vector<7x32xf32>
    %39 = tpu.matmul %37, %38, %cst_29 {dimension_numbers = #tpu.dot_dimension_numbers<[1], [0], [0], [1], [0, 0, 1, 1], [], []>} : vector<7x32xf32>, vector<32x32xf32>, vector<7x32xf32> -> vector<7x32xf32>
    %40 = arith.addf %1, %39 : vector<7x32xf32>
    %c0_30 = arith.constant 0 : index
    %c0_31 = arith.constant 0 : index
    %41 = vector.load %arg11[%c0_30, %c0_31] : memref<1x32xf32, #tpu.memory_space<vmem>>, vector<1x32xf32>
    %42 = vector.broadcast %41 : vector<1x32xf32> to vector<7x32xf32>
    %43 = arith.addf %40, %42 : vector<7x32xf32>
    %c0_32 = arith.constant 0 : index
    %c0_33 = arith.constant 0 : index
    %44 = vector.load %arg12[%c0_32, %c0_33] : memref<32x64xf32, #tpu.memory_space<vmem>>, vector<32x64xf32>
    %cst_34 = arith.constant dense<0.000000e+00> : vector<7x64xf32>
    %45 = tpu.matmul %43, %44, %cst_34 {dimension_numbers = #tpu.dot_dimension_numbers<[1], [0], [0], [1], [0, 0, 1, 1], [], []>} : vector<7x32xf32>, vector<32x64xf32>, vector<7x64xf32> -> vector<7x64xf32>
    %c0_35 = arith.constant 0 : index
    %c0_36 = arith.constant 0 : index
    %46 = vector.load %arg13[%c0_35, %c0_36] : memref<1x64xf32, #tpu.memory_space<vmem>>, vector<1x64xf32>
    %47 = vector.broadcast %46 : vector<1x64xf32> to vector<7x64xf32>
    %48 = arith.addf %45, %47 : vector<7x64xf32>
    %49 = vector.extract_strided_slice %48 {offsets = [0, 0], sizes = [7, 32], strides = [1, 1]} : vector<7x64xf32> to vector<7x32xf32>
    %50 = vector.extract_strided_slice %48 {offsets = [0, 32], sizes = [7, 32], strides = [1, 1]} : vector<7x64xf32> to vector<7x32xf32>
    %cst_37 = arith.constant dense<0.000000e+00> : vector<64x7xf32>
    %51 = tpu.matmul %18, %49, %cst_37 {dimension_numbers = #tpu.dot_dimension_numbers<[1], [1], [0], [0], [0, 0, 1, 0], [], []>} : vector<64x32xf32>, vector<7x32xf32>, vector<64x7xf32> -> vector<64x7xf32>
    %cst_38 = arith.constant 0.176776692 : f32
    %52 = vector.broadcast %cst_38 : f32 to vector<64x7xf32>
    %53 = arith.mulf %51, %52 : vector<64x7xf32>
    %cst_39 = arith.constant dense<0xFF800000> : vector<64xf32>
    %54 = vector.multi_reduction <maximumf>, %53, %cst_39 [1] : vector<64x7xf32> to vector<64xf32>
    %55 = vector.shape_cast %54 : vector<64xf32> to vector<64x1xf32>
    %56 = vector.broadcast %55 : vector<64x1xf32> to vector<64x7xf32>
    %57 = arith.subf %53, %56 : vector<64x7xf32>
    %58 = math.exp %57 : vector<64x7xf32>
    %cst_40 = arith.constant dense<0.000000e+00> : vector<64xf32>
    %59 = vector.multi_reduction <add>, %58, %cst_40 [1] : vector<64x7xf32> to vector<64xf32>
    %60 = vector.shape_cast %59 : vector<64xf32> to vector<64x1xf32>
    %61 = tpu.reciprocal %60 {approx = true} : vector<64x1xf32> -> vector<64x1xf32>
    %62 = vector.broadcast %61 : vector<64x1xf32> to vector<64x7xf32>
    %63 = arith.mulf %58, %62 : vector<64x7xf32>
    %cst_41 = arith.constant dense<0.000000e+00> : vector<64x32xf32>
    %64 = tpu.matmul %63, %50, %cst_41 {dimension_numbers = #tpu.dot_dimension_numbers<[1], [0], [0], [1], [0, 0, 1, 1], [], []>} : vector<64x7xf32>, vector<7x32xf32>, vector<64x32xf32> -> vector<64x32xf32>
    %c0_42 = arith.constant 0 : index
    %c0_43 = arith.constant 0 : index
    %65 = vector.load %arg14[%c0_42, %c0_43] : memref<32x32xf32, #tpu.memory_space<vmem>>, vector<32x32xf32>
    %cst_44 = arith.constant dense<0.000000e+00> : vector<64x32xf32>
    %66 = tpu.matmul %64, %65, %cst_44 {dimension_numbers = #tpu.dot_dimension_numbers<[1], [0], [0], [1], [0, 0, 1, 1], [], []>} : vector<64x32xf32>, vector<32x32xf32>, vector<64x32xf32> -> vector<64x32xf32>
    %67 = arith.addf %3, %66 : vector<64x32xf32>
    %c0_45 = arith.constant 0 : index
    %c0_46 = arith.constant 0 : index
    %68 = vector.load %arg15[%c0_45, %c0_46] : memref<1x32xf32, #tpu.memory_space<vmem>>, vector<1x32xf32>
    %69 = vector.broadcast %68 : vector<1x32xf32> to vector<64x32xf32>
    %70 = arith.addf %67, %69 : vector<64x32xf32>
    %71 = tpu.iota {dimensions = array<i32: 0>} : vector<32x32xi32>
    %72 = tpu.iota {dimensions = array<i32: 1>} : vector<32x32xi32>
    %73 = arith.cmpi eq, %71, %72 : vector<32x32xi32>
    %74 = arith.extui %73 : vector<32x32xi1> to vector<32x32xi32>
    %75 = arith.sitofp %74 : vector<32x32xi32> to vector<32x32xf32>
    %cst_47 = arith.constant dense<0.000000e+00> : vector<32x64xf32>
    %76 = tpu.matmul %75, %70, %cst_47 {dimension_numbers = #tpu.dot_dimension_numbers<[1], [1], [0], [0], [0, 0, 1, 0], [], []>} : vector<32x32xf32>, vector<64x32xf32>, vector<32x64xf32> -> vector<32x64xf32>
    %c0_48 = arith.constant 0 : index
    %c0_49 = arith.constant 0 : index
    %c0_50 = arith.constant 0 : index
    %77 = vector.load %arg29[%c0_48, %c0_49, %c0_50] : memref<1x32x64xf32, #tpu.memory_space<vmem>>, vector<1x32x64xf32>
    %78 = vector.shape_cast %77 : vector<1x32x64xf32> to vector<32x64xf32>
    %79 = vector.shape_cast %76 : vector<32x64xf32> to vector<1x32x64xf32>
    tpu.vector_store %arg29[%c0_48, %c0_49, %c0_50], %79 {strides = array<i32>} : memref<1x32x64xf32, #tpu.memory_space<vmem>>, vector<1x32x64xf32>,
    %80 = vector.extract_strided_slice %43 {offsets = [1, 0], sizes = [4, 32], strides = [1, 1]} : vector<7x32xf32> to vector<4x32xf32>
    %c0_51 = arith.constant 0 : index
    %c0_52 = arith.constant 0 : index
    %c0_53 = arith.constant 0 : index
    %81 = vector.load %arg28[%c0_51, %c0_52, %c0_53] : memref<1x4x32xf32, #tpu.memory_space<vmem>>, vector<1x4x32xf32>
    %82 = vector.shape_cast %81 : vector<1x4x32xf32> to vector<4x32xf32>
    %83 = vector.shape_cast %80 : vector<4x32xf32> to vector<1x4x32xf32>
    tpu.vector_store %arg28[%c0_51, %c0_52, %c0_53], %83 {strides = array<i32>} : memref<1x4x32xf32, #tpu.memory_space<vmem>>, vector<1x4x32xf32>,
    %84 = vector.extract_strided_slice %80 {offsets = [0, 0], sizes = [1, 32], strides = [1, 1]} : vector<4x32xf32> to vector<1x32xf32>
    %c0_54 = arith.constant 0 : index
    %c0_55 = arith.constant 0 : index
    %c0_56 = arith.constant 0 : index
    %85 = vector.load %arg16[%c0_54, %c0_55, %c0_56] : memref<4x32x32xf32, #tpu.memory_space<vmem>>, vector<1x32x32xf32>
    %86 = vector.shape_cast %85 : vector<1x32x32xf32> to vector<32x32xf32>
    %cst_57 = arith.constant dense<0.000000e+00> : vector<1x32xf32>
    %87 = tpu.matmul %84, %86, %cst_57 {dimension_numbers = #tpu.dot_dimension_numbers<[1], [0], [0], [1], [0, 0, 1, 1], [], []>} : vector<1x32xf32>, vector<32x32xf32>, vector<1x32xf32> -> vector<1x32xf32>
    %c0_58 = arith.constant 0 : index
    %c0_59 = arith.constant 0 : index
    %c0_60 = arith.constant 0 : index
    %88 = vector.load %arg17[%c0_58, %c0_59, %c0_60] : memref<4x1x32xf32, #tpu.memory_space<vmem>>, vector<1x1x32xf32>
    %89 = vector.shape_cast %88 : vector<1x1x32xf32> to vector<1x32xf32>
    %90 = arith.addf %87, %89 : vector<1x32xf32>
    %cst_61 = arith.constant 0.000000e+00 : f32
    %91 = vector.broadcast %cst_61 : f32 to vector<1x32xf32>
    %92 = arith.maximumf %90, %91 : vector<1x32xf32>
    %c0_62 = arith.constant 0 : index
    %c0_63 = arith.constant 0 : index
    %c0_64 = arith.constant 0 : index
    %93 = vector.load %arg18[%c0_62, %c0_63, %c0_64] : memref<4x32x32xf32, #tpu.memory_space<vmem>>, vector<1x32x32xf32>
    %94 = vector.shape_cast %93 : vector<1x32x32xf32> to vector<32x32xf32>
    %cst_65 = arith.constant dense<0.000000e+00> : vector<1x32xf32>
    %95 = tpu.matmul %92, %94, %cst_65 {dimension_numbers = #tpu.dot_dimension_numbers<[1], [0], [0], [1], [0, 0, 1, 1], [], []>} : vector<1x32xf32>, vector<32x32xf32>, vector<1x32xf32> -> vector<1x32xf32>
    %c0_66 = arith.constant 0 : index
    %c0_67 = arith.constant 0 : index
    %c0_68 = arith.constant 0 : index
    %96 = vector.load %arg19[%c0_66, %c0_67, %c0_68] : memref<4x1x32xf32, #tpu.memory_space<vmem>>, vector<1x1x32xf32>
    %97 = vector.shape_cast %96 : vector<1x1x32xf32> to vector<1x32xf32>
    %98 = arith.addf %95, %97 : vector<1x32xf32>
    %cst_69 = arith.constant 0.000000e+00 : f32
    %99 = vector.broadcast %cst_69 : f32 to vector<1x32xf32>
    %100 = arith.maximumf %98, %99 : vector<1x32xf32>
    %c0_70 = arith.constant 0 : index
    %c0_71 = arith.constant 0 : index
    %c0_72 = arith.constant 0 : index
    %101 = vector.load %arg20[%c0_70, %c0_71, %c0_72] : memref<4x32x4xf32, #tpu.memory_space<vmem>>, vector<1x32x4xf32>
    %102 = vector.shape_cast %101 : vector<1x32x4xf32> to vector<32x4xf32>
    %cst_73 = arith.constant dense<0.000000e+00> : vector<1x4xf32>
    %103 = tpu.matmul %100, %102, %cst_73 {dimension_numbers = #tpu.dot_dimension_numbers<[1], [0], [0], [1], [0, 0, 1, 1], [], []>} : vector<1x32xf32>, vector<32x4xf32>, vector<1x4xf32> -> vector<1x4xf32>
    %c0_74 = arith.constant 0 : index
    %c0_75 = arith.constant 0 : index
    %c0_76 = arith.constant 0 : index
    %104 = vector.load %arg21[%c0_74, %c0_75, %c0_76] : memref<4x1x4xf32, #tpu.memory_space<vmem>>, vector<1x1x4xf32>
    %105 = vector.shape_cast %104 : vector<1x1x4xf32> to vector<1x4xf32>
    %106 = arith.addf %103, %105 : vector<1x4xf32>
    %107 = vector.extract_strided_slice %80 {offsets = [1, 0], sizes = [1, 32], strides = [1, 1]} : vector<4x32xf32> to vector<1x32xf32>
    %c1 = arith.constant 1 : index
    %c0_77 = arith.constant 0 : index
    %c0_78 = arith.constant 0 : index
    %108 = vector.load %arg16[%c1, %c0_77, %c0_78] : memref<4x32x32xf32, #tpu.memory_space<vmem>>, vector<1x32x32xf32>
    %109 = vector.shape_cast %108 : vector<1x32x32xf32> to vector<32x32xf32>
    %cst_79 = arith.constant dense<0.000000e+00> : vector<1x32xf32>
    %110 = tpu.matmul %107, %109, %cst_79 {dimension_numbers = #tpu.dot_dimension_numbers<[1], [0], [0], [1], [0, 0, 1, 1], [], []>} : vector<1x32xf32>, vector<32x32xf32>, vector<1x32xf32> -> vector<1x32xf32>
    %c1_80 = arith.constant 1 : index
    %c0_81 = arith.constant 0 : index
    %c0_82 = arith.constant 0 : index
    %111 = vector.load %arg17[%c1_80, %c0_81, %c0_82] : memref<4x1x32xf32, #tpu.memory_space<vmem>>, vector<1x1x32xf32>
    %112 = vector.shape_cast %111 : vector<1x1x32xf32> to vector<1x32xf32>
    %113 = arith.addf %110, %112 : vector<1x32xf32>
    %cst_83 = arith.constant 0.000000e+00 : f32
    %114 = vector.broadcast %cst_83 : f32 to vector<1x32xf32>
    %115 = arith.maximumf %113, %114 : vector<1x32xf32>
    %c1_84 = arith.constant 1 : index
    %c0_85 = arith.constant 0 : index
    %c0_86 = arith.constant 0 : index
    %116 = vector.load %arg18[%c1_84, %c0_85, %c0_86] : memref<4x32x32xf32, #tpu.memory_space<vmem>>, vector<1x32x32xf32>
    %117 = vector.shape_cast %116 : vector<1x32x32xf32> to vector<32x32xf32>
    %cst_87 = arith.constant dense<0.000000e+00> : vector<1x32xf32>
    %118 = tpu.matmul %115, %117, %cst_87 {dimension_numbers = #tpu.dot_dimension_numbers<[1], [0], [0], [1], [0, 0, 1, 1], [], []>} : vector<1x32xf32>, vector<32x32xf32>, vector<1x32xf32> -> vector<1x32xf32>
    %c1_88 = arith.constant 1 : index
    %c0_89 = arith.constant 0 : index
    %c0_90 = arith.constant 0 : index
    %119 = vector.load %arg19[%c1_88, %c0_89, %c0_90] : memref<4x1x32xf32, #tpu.memory_space<vmem>>, vector<1x1x32xf32>
    %120 = vector.shape_cast %119 : vector<1x1x32xf32> to vector<1x32xf32>
    %121 = arith.addf %118, %120 : vector<1x32xf32>
    %cst_91 = arith.constant 0.000000e+00 : f32
    %122 = vector.broadcast %cst_91 : f32 to vector<1x32xf32>
    %123 = arith.maximumf %121, %122 : vector<1x32xf32>
    %c1_92 = arith.constant 1 : index
    %c0_93 = arith.constant 0 : index
    %c0_94 = arith.constant 0 : index
    %124 = vector.load %arg20[%c1_92, %c0_93, %c0_94] : memref<4x32x4xf32, #tpu.memory_space<vmem>>, vector<1x32x4xf32>
    %125 = vector.shape_cast %124 : vector<1x32x4xf32> to vector<32x4xf32>
    %cst_95 = arith.constant dense<0.000000e+00> : vector<1x4xf32>
    %126 = tpu.matmul %123, %125, %cst_95 {dimension_numbers = #tpu.dot_dimension_numbers<[1], [0], [0], [1], [0, 0, 1, 1], [], []>} : vector<1x32xf32>, vector<32x4xf32>, vector<1x4xf32> -> vector<1x4xf32>
    %c1_96 = arith.constant 1 : index
    %c0_97 = arith.constant 0 : index
    %c0_98 = arith.constant 0 : index
    %127 = vector.load %arg21[%c1_96, %c0_97, %c0_98] : memref<4x1x4xf32, #tpu.memory_space<vmem>>, vector<1x1x4xf32>
    %128 = vector.shape_cast %127 : vector<1x1x4xf32> to vector<1x4xf32>
    %129 = arith.addf %126, %128 : vector<1x4xf32>
    %130 = vector.extract_strided_slice %80 {offsets = [2, 0], sizes = [1, 32], strides = [1, 1]} : vector<4x32xf32> to vector<1x32xf32>
    %c2 = arith.constant 2 : index
    %c0_99 = arith.constant 0 : index
    %c0_100 = arith.constant 0 : index
    %131 = vector.load %arg16[%c2, %c0_99, %c0_100] : memref<4x32x32xf32, #tpu.memory_space<vmem>>, vector<1x32x32xf32>
    %132 = vector.shape_cast %131 : vector<1x32x32xf32> to vector<32x32xf32>
    %cst_101 = arith.constant dense<0.000000e+00> : vector<1x32xf32>
    %133 = tpu.matmul %130, %132, %cst_101 {dimension_numbers = #tpu.dot_dimension_numbers<[1], [0], [0], [1], [0, 0, 1, 1], [], []>} : vector<1x32xf32>, vector<32x32xf32>, vector<1x32xf32> -> vector<1x32xf32>
    %c2_102 = arith.constant 2 : index
    %c0_103 = arith.constant 0 : index
    %c0_104 = arith.constant 0 : index
    %134 = vector.load %arg17[%c2_102, %c0_103, %c0_104] : memref<4x1x32xf32, #tpu.memory_space<vmem>>, vector<1x1x32xf32>
    %135 = vector.shape_cast %134 : vector<1x1x32xf32> to vector<1x32xf32>
    %136 = arith.addf %133, %135 : vector<1x32xf32>
    %cst_105 = arith.constant 0.000000e+00 : f32
    %137 = vector.broadcast %cst_105 : f32 to vector<1x32xf32>
    %138 = arith.maximumf %136, %137 : vector<1x32xf32>
    %c2_106 = arith.constant 2 : index
    %c0_107 = arith.constant 0 : index
    %c0_108 = arith.constant 0 : index
    %139 = vector.load %arg18[%c2_106, %c0_107, %c0_108] : memref<4x32x32xf32, #tpu.memory_space<vmem>>, vector<1x32x32xf32>
    %140 = vector.shape_cast %139 : vector<1x32x32xf32> to vector<32x32xf32>
    %cst_109 = arith.constant dense<0.000000e+00> : vector<1x32xf32>
    %141 = tpu.matmul %138, %140, %cst_109 {dimension_numbers = #tpu.dot_dimension_numbers<[1], [0], [0], [1], [0, 0, 1, 1], [], []>} : vector<1x32xf32>, vector<32x32xf32>, vector<1x32xf32> -> vector<1x32xf32>
    %c2_110 = arith.constant 2 : index
    %c0_111 = arith.constant 0 : index
    %c0_112 = arith.constant 0 : index
    %142 = vector.load %arg19[%c2_110, %c0_111, %c0_112] : memref<4x1x32xf32, #tpu.memory_space<vmem>>, vector<1x1x32xf32>
    %143 = vector.shape_cast %142 : vector<1x1x32xf32> to vector<1x32xf32>
    %144 = arith.addf %141, %143 : vector<1x32xf32>
    %cst_113 = arith.constant 0.000000e+00 : f32
    %145 = vector.broadcast %cst_113 : f32 to vector<1x32xf32>
    %146 = arith.maximumf %144, %145 : vector<1x32xf32>
    %c2_114 = arith.constant 2 : index
    %c0_115 = arith.constant 0 : index
    %c0_116 = arith.constant 0 : index
    %147 = vector.load %arg20[%c2_114, %c0_115, %c0_116] : memref<4x32x4xf32, #tpu.memory_space<vmem>>, vector<1x32x4xf32>
    %148 = vector.shape_cast %147 : vector<1x32x4xf32> to vector<32x4xf32>
    %cst_117 = arith.constant dense<0.000000e+00> : vector<1x4xf32>
    %149 = tpu.matmul %146, %148, %cst_117 {dimension_numbers = #tpu.dot_dimension_numbers<[1], [0], [0], [1], [0, 0, 1, 1], [], []>} : vector<1x32xf32>, vector<32x4xf32>, vector<1x4xf32> -> vector<1x4xf32>
    %c2_118 = arith.constant 2 : index
    %c0_119 = arith.constant 0 : index
    %c0_120 = arith.constant 0 : index
    %150 = vector.load %arg21[%c2_118, %c0_119, %c0_120] : memref<4x1x4xf32, #tpu.memory_space<vmem>>, vector<1x1x4xf32>
    %151 = vector.shape_cast %150 : vector<1x1x4xf32> to vector<1x4xf32>
    %152 = arith.addf %149, %151 : vector<1x4xf32>
    %153 = vector.extract_strided_slice %80 {offsets = [3, 0], sizes = [1, 32], strides = [1, 1]} : vector<4x32xf32> to vector<1x32xf32>
    %c3 = arith.constant 3 : index
    %c0_121 = arith.constant 0 : index
    %c0_122 = arith.constant 0 : index
    %154 = vector.load %arg16[%c3, %c0_121, %c0_122] : memref<4x32x32xf32, #tpu.memory_space<vmem>>, vector<1x32x32xf32>
    %155 = vector.shape_cast %154 : vector<1x32x32xf32> to vector<32x32xf32>
    %cst_123 = arith.constant dense<0.000000e+00> : vector<1x32xf32>
    %156 = tpu.matmul %153, %155, %cst_123 {dimension_numbers = #tpu.dot_dimension_numbers<[1], [0], [0], [1], [0, 0, 1, 1], [], []>} : vector<1x32xf32>, vector<32x32xf32>, vector<1x32xf32> -> vector<1x32xf32>
    %c3_124 = arith.constant 3 : index
    %c0_125 = arith.constant 0 : index
    %c0_126 = arith.constant 0 : index
    %157 = vector.load %arg17[%c3_124, %c0_125, %c0_126] : memref<4x1x32xf32, #tpu.memory_space<vmem>>, vector<1x1x32xf32>
    %158 = vector.shape_cast %157 : vector<1x1x32xf32> to vector<1x32xf32>
    %159 = arith.addf %156, %158 : vector<1x32xf32>
    %cst_127 = arith.constant 0.000000e+00 : f32
    %160 = vector.broadcast %cst_127 : f32 to vector<1x32xf32>
    %161 = arith.maximumf %159, %160 : vector<1x32xf32>
    %c3_128 = arith.constant 3 : index
    %c0_129 = arith.constant 0 : index
    %c0_130 = arith.constant 0 : index
    %162 = vector.load %arg18[%c3_128, %c0_129, %c0_130] : memref<4x32x32xf32, #tpu.memory_space<vmem>>, vector<1x32x32xf32>
    %163 = vector.shape_cast %162 : vector<1x32x32xf32> to vector<32x32xf32>
    %cst_131 = arith.constant dense<0.000000e+00> : vector<1x32xf32>
    %164 = tpu.matmul %161, %163, %cst_131 {dimension_numbers = #tpu.dot_dimension_numbers<[1], [0], [0], [1], [0, 0, 1, 1], [], []>} : vector<1x32xf32>, vector<32x32xf32>, vector<1x32xf32> -> vector<1x32xf32>
    %c3_132 = arith.constant 3 : index
    %c0_133 = arith.constant 0 : index
    %c0_134 = arith.constant 0 : index
    %165 = vector.load %arg19[%c3_132, %c0_133, %c0_134] : memref<4x1x32xf32, #tpu.memory_space<vmem>>, vector<1x1x32xf32>
    %166 = vector.shape_cast %165 : vector<1x1x32xf32> to vector<1x32xf32>
    %167 = arith.addf %164, %166 : vector<1x32xf32>
    %cst_135 = arith.constant 0.000000e+00 : f32
    %168 = vector.broadcast %cst_135 : f32 to vector<1x32xf32>
    %169 = arith.maximumf %167, %168 : vector<1x32xf32>
    %c3_136 = arith.constant 3 : index
    %c0_137 = arith.constant 0 : index
    %c0_138 = arith.constant 0 : index
    %170 = vector.load %arg20[%c3_136, %c0_137, %c0_138] : memref<4x32x4xf32, #tpu.memory_space<vmem>>, vector<1x32x4xf32>
    %171 = vector.shape_cast %170 : vector<1x32x4xf32> to vector<32x4xf32>
    %cst_139 = arith.constant dense<0.000000e+00> : vector<1x4xf32>
    %172 = tpu.matmul %169, %171, %cst_139 {dimension_numbers = #tpu.dot_dimension_numbers<[1], [0], [0], [1], [0, 0, 1, 1], [], []>} : vector<1x32xf32>, vector<32x4xf32>, vector<1x4xf32> -> vector<1x4xf32>
    %c3_140 = arith.constant 3 : index
    %c0_141 = arith.constant 0 : index
    %c0_142 = arith.constant 0 : index
    %173 = vector.load %arg21[%c3_140, %c0_141, %c0_142] : memref<4x1x4xf32, #tpu.memory_space<vmem>>, vector<1x1x4xf32>
    %174 = vector.shape_cast %173 : vector<1x1x4xf32> to vector<1x4xf32>
    %175 = arith.addf %172, %174 : vector<1x4xf32>
    %176 = tpu.concatenate %106, %129, %152, %175 in 0 : vector<1x4xf32>, vector<1x4xf32>, vector<1x4xf32>, vector<1x4xf32> -> vector<4x4xf32>
    %c0_143 = arith.constant 0 : index
    %c0_144 = arith.constant 0 : index
    %c0_145 = arith.constant 0 : index
    %177 = vector.load %arg30[%c0_143, %c0_144, %c0_145] : memref<1x4x4xf32, #tpu.memory_space<vmem>>, vector<1x4x4xf32>
    %178 = vector.shape_cast %177 : vector<1x4x4xf32> to vector<4x4xf32>
    %179 = vector.shape_cast %176 : vector<4x4xf32> to vector<1x4x4xf32>
    tpu.vector_store %arg30[%c0_143, %c0_144, %c0_145], %179 {strides = array<i32>} : memref<1x4x4xf32, #tpu.memory_space<vmem>>, vector<1x4x4xf32>,
    %180 = vector.extract_strided_slice %43 {offsets = [0, 0], sizes = [1, 32], strides = [1, 1]} : vector<7x32xf32> to vector<1x32xf32>
    %c0_146 = arith.constant 0 : index
    %c0_147 = arith.constant 0 : index
    %181 = vector.load %arg22[%c0_146, %c0_147] : memref<32x32xf32, #tpu.memory_space<vmem>>, vector<32x32xf32>
    %cst_148 = arith.constant dense<0.000000e+00> : vector<1x32xf32>
    %182 = tpu.matmul %180, %181, %cst_148 {dimension_numbers = #tpu.dot_dimension_numbers<[1], [0], [0], [1], [0, 0, 1, 1], [], []>} : vector<1x32xf32>, vector<32x32xf32>, vector<1x32xf32> -> vector<1x32xf32>
    %c0_149 = arith.constant 0 : index
    %c0_150 = arith.constant 0 : index
    %183 = vector.load %arg23[%c0_149, %c0_150] : memref<1x32xf32, #tpu.memory_space<vmem>>, vector<1x32xf32>
    %184 = arith.addf %182, %183 : vector<1x32xf32>
    %cst_151 = arith.constant 0.000000e+00 : f32
    %185 = vector.broadcast %cst_151 : f32 to vector<1x32xf32>
    %186 = arith.maximumf %184, %185 : vector<1x32xf32>
    %c0_152 = arith.constant 0 : index
    %c0_153 = arith.constant 0 : index
    %187 = vector.load %arg24[%c0_152, %c0_153] : memref<32x32xf32, #tpu.memory_space<vmem>>, vector<32x32xf32>
    %cst_154 = arith.constant dense<0.000000e+00> : vector<1x32xf32>
    %188 = tpu.matmul %186, %187, %cst_154 {dimension_numbers = #tpu.dot_dimension_numbers<[1], [0], [0], [1], [0, 0, 1, 1], [], []>} : vector<1x32xf32>, vector<32x32xf32>, vector<1x32xf32> -> vector<1x32xf32>
    %c0_155 = arith.constant 0 : index
    %c0_156 = arith.constant 0 : index
    %189 = vector.load %arg25[%c0_155, %c0_156] : memref<1x32xf32, #tpu.memory_space<vmem>>, vector<1x32xf32>
    %190 = arith.addf %188, %189 : vector<1x32xf32>
    %cst_157 = arith.constant 0.000000e+00 : f32
    %191 = vector.broadcast %cst_157 : f32 to vector<1x32xf32>
    %192 = arith.maximumf %190, %191 : vector<1x32xf32>
    %c0_158 = arith.constant 0 : index
    %c0_159 = arith.constant 0 : index
    %193 = vector.load %arg26[%c0_158, %c0_159] : memref<32x4xf32, #tpu.memory_space<vmem>>, vector<32x4xf32>
    %cst_160 = arith.constant dense<0.000000e+00> : vector<1x4xf32>
    %194 = tpu.matmul %192, %193, %cst_160 {dimension_numbers = #tpu.dot_dimension_numbers<[1], [0], [0], [1], [0, 0, 1, 1], [], []>} : vector<1x32xf32>, vector<32x4xf32>, vector<1x4xf32> -> vector<1x4xf32>
    %c0_161 = arith.constant 0 : index
    %c0_162 = arith.constant 0 : index
    %195 = vector.load %arg27[%c0_161, %c0_162] : memref<1x4xf32, #tpu.memory_space<vmem>>, vector<1x4xf32>
    %196 = arith.addf %194, %195 : vector<1x4xf32>
    %c0_163 = arith.constant 0 : index
    %c0_164 = arith.constant 0 : index
    %c0_165 = arith.constant 0 : index
    %197 = vector.load %arg31[%c0_163, %c0_164, %c0_165] : memref<1x1x4xf32, #tpu.memory_space<vmem>>, vector<1x1x4xf32>
    %198 = vector.shape_cast %197 : vector<1x1x4xf32> to vector<1x4xf32>
    %199 = vector.shape_cast %196 : vector<1x4xf32> to vector<1x1x4xf32>
    tpu.vector_store %arg31[%c0_163, %c0_164, %c0_165], %199 {strides = array<i32>} : memref<1x1x4xf32, #tpu.memory_space<vmem>>, vector<1x1x4xf32>,
    return
  }
  func.func @transform_0(%arg0: i32) -> (i32, i32, i32) {
    %c0_i32 = arith.constant 0 : i32
    %c0_i32_0 = arith.constant 0 : i32
    %c0_i32_1 = arith.constant 0 : i32
    return %arg0, %c0_i32, %c0_i32_0 : i32, i32, i32
  }
  func.func @transform_1(%arg0: i32) -> (i32, i32, i32) {
    %c0_i32 = arith.constant 0 : i32
    %c0_i32_0 = arith.constant 0 : i32
    %c0_i32_1 = arith.constant 0 : i32
    return %arg0, %c0_i32, %c0_i32_0 : i32, i32, i32
  }
  func.func @transform_2(%arg0: i32) -> (i32, i32, i32) {
    %c0_i32 = arith.constant 0 : i32
    %c0_i32_0 = arith.constant 0 : i32
    %c0_i32_1 = arith.constant 0 : i32
    return %arg0, %c0_i32, %c0_i32_0 : i32, i32, i32
  }
  func.func @transform_3(%arg0: i32) -> (i32, i32) {
    %c0_i32 = arith.constant 0 : i32
    %c0_i32_0 = arith.constant 0 : i32
    %c0_i32_1 = arith.constant 0 : i32
    return %c0_i32, %c0_i32_0 : i32, i32
  }
  func.func @transform_4(%arg0: i32) -> (i32, i32) {
    %c0_i32 = arith.constant 0 : i32
    %c0_i32_0 = arith.constant 0 : i32
    %c0_i32_1 = arith.constant 0 : i32
    return %c0_i32, %c0_i32_0 : i32, i32
  }
  func.func @transform_5(%arg0: i32) -> (i32, i32) {
    %c0_i32 = arith.constant 0 : i32
    %c0_i32_0 = arith.constant 0 : i32
    %c0_i32_1 = arith.constant 0 : i32
    return %c0_i32, %c0_i32_0 : i32, i32
  }
  func.func @transform_6(%arg0: i32) -> (i32, i32) {
    %c0_i32 = arith.constant 0 : i32
    %c0_i32_0 = arith.constant 0 : i32
    %c0_i32_1 = arith.constant 0 : i32
    return %c0_i32, %c0_i32_0 : i32, i32
  }
  func.func @transform_7(%arg0: i32) -> (i32, i32) {
    %c0_i32 = arith.constant 0 : i32
    %c0_i32_0 = arith.constant 0 : i32
    %c0_i32_1 = arith.constant 0 : i32
    return %c0_i32, %c0_i32_0 : i32, i32
  }
  func.func @transform_8(%arg0: i32) -> (i32, i32) {
    %c0_i32 = arith.constant 0 : i32
    %c0_i32_0 = arith.constant 0 : i32
    %c0_i32_1 = arith.constant 0 : i32
    return %c0_i32, %c0_i32_0 : i32, i32
  }
  func.func @transform_9(%arg0: i32) -> (i32, i32) {
    %c0_i32 = arith.constant 0 : i32
    %c0_i32_0 = arith.constant 0 : i32
    %c0_i32_1 = arith.constant 0 : i32
    return %c0_i32, %c0_i32_0 : i32, i32
  }
  func.func @transform_10(%arg0: i32) -> (i32, i32) {
    %c0_i32 = arith.constant 0 : i32
    %c0_i32_0 = arith.constant 0 : i32
    %c0_i32_1 = arith.constant 0 : i32
    return %c0_i32, %c0_i32_0 : i32, i32
  }
  func.func @transform_11(%arg0: i32) -> (i32, i32) {
    %c0_i32 = arith.constant 0 : i32
    %c0_i32_0 = arith.constant 0 : i32
    %c0_i32_1 = arith.constant 0 : i32
    return %c0_i32, %c0_i32_0 : i32, i32
  }
  func.func @transform_12(%arg0: i32) -> (i32, i32) {
    %c0_i32 = arith.constant 0 : i32
    %c0_i32_0 = arith.constant 0 : i32
    %c0_i32_1 = arith.constant 0 : i32
    return %c0_i32, %c0_i32_0 : i32, i32
  }
  func.func @transform_13(%arg0: i32) -> (i32, i32) {
    %c0_i32 = arith.constant 0 : i32
    %c0_i32_0 = arith.constant 0 : i32
    %c0_i32_1 = arith.constant 0 : i32
    return %c0_i32, %c0_i32_0 : i32, i32
  }
  func.func @transform_14(%arg0: i32) -> (i32, i32) {
    %c0_i32 = arith.constant 0 : i32
    %c0_i32_0 = arith.constant 0 : i32
    %c0_i32_1 = arith.constant 0 : i32
    return %c0_i32, %c0_i32_0 : i32, i32
  }
  func.func @transform_15(%arg0: i32) -> (i32, i32, i32) {
    %c0_i32 = arith.constant 0 : i32
    %c0_i32_0 = arith.constant 0 : i32
    %c0_i32_1 = arith.constant 0 : i32
    %c0_i32_2 = arith.constant 0 : i32
    return %c0_i32, %c0_i32_0, %c0_i32_1 : i32, i32, i32
  }
  func.func @transform_16(%arg0: i32) -> (i32, i32, i32) {
    %c0_i32 = arith.constant 0 : i32
    %c0_i32_0 = arith.constant 0 : i32
    %c0_i32_1 = arith.constant 0 : i32
    %c0_i32_2 = arith.constant 0 : i32
    return %c0_i32, %c0_i32_0, %c0_i32_1 : i32, i32, i32
  }
  func.func @transform_17(%arg0: i32) -> (i32, i32, i32) {
    %c0_i32 = arith.constant 0 : i32
    %c0_i32_0 = arith.constant 0 : i32
    %c0_i32_1 = arith.constant 0 : i32
    %c0_i32_2 = arith.constant 0 : i32
    return %c0_i32, %c0_i32_0, %c0_i32_1 : i32, i32, i32
  }
  func.func @transform_18(%arg0: i32) -> (i32, i32, i32) {
    %c0_i32 = arith.constant 0 : i32
    %c0_i32_0 = arith.constant 0 : i32
    %c0_i32_1 = arith.constant 0 : i32
    %c0_i32_2 = arith.constant 0 : i32
    return %c0_i32, %c0_i32_0, %c0_i32_1 : i32, i32, i32
  }
  func.func @transform_19(%arg0: i32) -> (i32, i32, i32) {
    %c0_i32 = arith.constant 0 : i32
    %c0_i32_0 = arith.constant 0 : i32
    %c0_i32_1 = arith.constant 0 : i32
    %c0_i32_2 = arith.constant 0 : i32
    return %c0_i32, %c0_i32_0, %c0_i32_1 : i32, i32, i32
  }
  func.func @transform_20(%arg0: i32) -> (i32, i32, i32) {
    %c0_i32 = arith.constant 0 : i32
    %c0_i32_0 = arith.constant 0 : i32
    %c0_i32_1 = arith.constant 0 : i32
    %c0_i32_2 = arith.constant 0 : i32
    return %c0_i32, %c0_i32_0, %c0_i32_1 : i32, i32, i32
  }
  func.func @transform_21(%arg0: i32) -> (i32, i32) {
    %c0_i32 = arith.constant 0 : i32
    %c0_i32_0 = arith.constant 0 : i32
    %c0_i32_1 = arith.constant 0 : i32
    return %c0_i32, %c0_i32_0 : i32, i32
  }
  func.func @transform_22(%arg0: i32) -> (i32, i32) {
    %c0_i32 = arith.constant 0 : i32
    %c0_i32_0 = arith.constant 0 : i32
    %c0_i32_1 = arith.constant 0 : i32
    return %c0_i32, %c0_i32_0 : i32, i32
  }
  func.func @transform_23(%arg0: i32) -> (i32, i32) {
    %c0_i32 = arith.constant 0 : i32
    %c0_i32_0 = arith.constant 0 : i32
    %c0_i32_1 = arith.constant 0 : i32
    return %c0_i32, %c0_i32_0 : i32, i32
  }
  func.func @transform_24(%arg0: i32) -> (i32, i32) {
    %c0_i32 = arith.constant 0 : i32
    %c0_i32_0 = arith.constant 0 : i32
    %c0_i32_1 = arith.constant 0 : i32
    return %c0_i32, %c0_i32_0 : i32, i32
  }
  func.func @transform_25(%arg0: i32) -> (i32, i32) {
    %c0_i32 = arith.constant 0 : i32
    %c0_i32_0 = arith.constant 0 : i32
    %c0_i32_1 = arith.constant 0 : i32
    return %c0_i32, %c0_i32_0 : i32, i32
  }
  func.func @transform_26(%arg0: i32) -> (i32, i32) {
    %c0_i32 = arith.constant 0 : i32
    %c0_i32_0 = arith.constant 0 : i32
    %c0_i32_1 = arith.constant 0 : i32
    return %c0_i32, %c0_i32_0 : i32, i32
  }
  func.func @transform_27(%arg0: i32) -> (i32, i32, i32) {
    %c0_i32 = arith.constant 0 : i32
    %c0_i32_0 = arith.constant 0 : i32
    %c0_i32_1 = arith.constant 0 : i32
    return %arg0, %c0_i32, %c0_i32_0 : i32, i32, i32
  }
  func.func @transform_28(%arg0: i32) -> (i32, i32, i32) {
    %c0_i32 = arith.constant 0 : i32
    %c0_i32_0 = arith.constant 0 : i32
    %c0_i32_1 = arith.constant 0 : i32
    return %arg0, %c0_i32, %c0_i32_0 : i32, i32, i32
  }
  func.func @transform_29(%arg0: i32) -> (i32, i32, i32) {
    %c0_i32 = arith.constant 0 : i32
    %c0_i32_0 = arith.constant 0 : i32
    %c0_i32_1 = arith.constant 0 : i32
    return %arg0, %c0_i32, %c0_i32_0 : i32, i32, i32
  }
  func.func @transform_30(%arg0: i32) -> (i32, i32, i32) {
    %c0_i32 = arith.constant 0 : i32
    %c0_i32_0 = arith.constant 0 : i32
    %c0_i32_1 = arith.constant 0 : i32
    return %arg0, %c0_i32, %c0_i32_0 : i32, i32, i32
  }
}

</mosaic_0001>

<bundles_post_ra>
// kernel: tpu_custom_call.1
= control target key start
LH: loop header
LB: loop body
LE: loop exit
PB: predicated region body
PF: predicated region fallthrough
CT: control target
= control target key end

     0   :  { %s5418_s6 = smov 1   ;;  %s5419_s10 = smov 2   ;;  %s6335_s0 = inlined_call_operand.smem [shape: u32[31], index: -1, kind: input, shape index: {}] }
   0x1   :  { %s5478_s5 = sld [smem:[%s6335_s0]]   ;;  %s5420_s14 = smov 3  }
   0x2   :  { %s5483_s9 = sld [smem:[%s6335_s0 + %s5418_s6]]   ;;  %s5421_s18 = smov 4  }
   0x3   :  { %s5488_s13 = sld [smem:[%s6335_s0 + %s5419_s10]]   ;;  %s5422_s22 = smov 5  }
   0x4   :  { %s5493_s17 = sld [smem:[%s6335_s0 + %s5420_s14]]   ;;  %s5423_s26 = smov 6  }
   0x5   :  { %s5498_s21 = sld [smem:[%s6335_s0 + %s5421_s18]]   ;;  %s5424_s30 = smov 7  }
   0x6   :  { %s5503_s25 = sld [smem:[%s6335_s0 + %s5422_s22]]   ;;  %s5425_s4 = smov 8  }
   0x7   :  { %6369 = sst [smem:[#allocation31_spill]] %s5478_s5  ;;  %s5426_s10 = smov 9  }
   0x8   :  { %6370 = sst [smem:[#allocation32_spill]] %s5483_s9  ;;  %s5427_s15 = smov 10  }
   0x9   :  { %6371 = sst [smem:[#allocation33_spill]] %s5488_s13  ;;  %s5428_s20 = smov 11  }
   0xa   :  { %6372 = sst [smem:[#allocation34_spill]] %s5493_s17  ;;  %s5430_s1 = smov 13  }
   0xb   :  { %6373 = sst [smem:[#allocation35_spill]] %s5498_s21  ;;  %s5431_s7 = smov 14  }
   0xc   :  { %s5508_s29 = sld [smem:[%s6335_s0 + %s5423_s26]]   ;;  %s5429_s26 = smov 12  }
   0xd   :  { %s5513_s3 = sld [smem:[%s6335_s0 + %s5424_s30]]   ;;  %s5433_s22 = smov 16  }
   0xe   :  { %s5518_s8 = sld [smem:[%s6335_s0 + %s5425_s4]]   ;;  %s5434_s28 = smov 17  }
   0xf   :  { %s5523_s14 = sld [smem:[%s6335_s0 + %s5426_s10]]  }
  0x10   :  { %s5528_s19 = sld [smem:[%s6335_s0 + %s5427_s15]]   ;;  %s5432_s15 = smov 15  }
  0x11   :  { %s5533_s24 = sld [smem:[%s6335_s0 + %s5428_s20]]  }
  0x12   :  { %6374 = sst [smem:[#allocation36_spill]] %s5508_s29 }
  0x13   :  { %6375 = sst [smem:[#allocation37_spill]] %s5513_s3 }
  0x14   :  { %6376 = sst [smem:[#allocation38_spill]] %s5518_s8 }
  0x15   :  { %6377 = sst [smem:[#allocation39_spill]] %s5523_s14 }
  0x16   :  { %6378 = sst [smem:[#allocation40_spill]] %s5528_s19 }
  0x17   :  { %6379 = sst [smem:[#allocation41_spill]] %s5533_s24 }
  0x18   :  { %s5538_s30 = sld [smem:[%s6335_s0 + %s5429_s26]]  }
  0x19   :  { %s5543_s6 = sld [smem:[%s6335_s0 + %s5430_s1]]  }
  0x1a   :  { %s5548_s12 = sld [smem:[%s6335_s0 + %s5431_s7]]   ;;  %s5435_s7 = smov 18  }
  0x1b   :  { %s5553_s20 = sld [smem:[%s6335_s0 + %s5432_s15]]   ;;  %s5436_s15 = smov 19  }
  0x1c   :  { %s5558_s27 = sld [smem:[%s6335_s0 + %s5433_s22]]   ;;  %s5437_s22 = smov 20  }
  0x1d   :  { %s5563_s4 = sld [smem:[%s6335_s0 + %s5434_s28]]   ;;  %s5438_s28 = smov 21  }
  0x1e   :  { %s5578_s24 = sld [smem:[%s6335_s0 + %s5437_s22]]   ;;  %s5441_s22 = smov 24  }
  0x1f   :  { %6380 = sst [smem:[#allocation42_spill]] %s5543_s6 }
  0x20   :  { %6381 = sst [smem:[#allocation43_spill]] %s5548_s12 }
  0x21   :  { %6382 = sst [smem:[#allocation44_spill]] %s5553_s20 }
  0x22   :  { %s5568_s6 = sld [smem:[%s6335_s0 + %s5435_s7]]   ;;  %s5439_s7 = smov 22  }
  0x23   :  { %6383 = sst [smem:[#allocation45_spill]] %s5563_s4 }
  0x24   :  { %s5573_s20 = sld [smem:[%s6335_s0 + %s5436_s15]]   ;;  %s5440_s15 = smov 23  }
  0x25   :  { %s5583_s4 = sld [smem:[%s6335_s0 + %s5438_s28]]   ;;  %s5442_s28 = smov 25  }
  0x26   :  { %s5588_s14 = sld [smem:[%s6335_s0 + %s5439_s7]]   ;;  %s5443_s7 = smov 26  }
  0x27   :  { %s5598_s3 = sld [smem:[%s6335_s0 + %s5441_s22]]   ;;  %s5445_s22 = smov 28  }
  0x28   :  { %6384 = sst [smem:[#allocation46_spill]] %s5568_s6 }
  0x29   :  { %s5608_s21 = sld [smem:[%s6335_s0 + %s5443_s7]]   ;;  %s5447_s7 = smov 30  }
  0x2a   :  { %6385 = sst [smem:[#allocation47_spill]] %s5573_s20 }
  0x2b   :  { %6386 = sst [smem:[#allocation48_spill]] %s5583_s4 }
  0x2c   :  { %6387 = sst [smem:[#allocation49_spill]] %s5588_s14 }
  0x2d   :  { %s5593_s20 = sld [smem:[%s6335_s0 + %s5440_s15]]   ;;  %s5444_s15 = smov 27  }
  0x2e   :  { %6388 = sst [smem:[#allocation50_spill]] %s5598_s3 }
  0x2f   :  { %s5603_s4 = sld [smem:[%s6335_s0 + %s5442_s28]]   ;;  %s5446_s28 = smov 29  }
  0x30   :  { %6390 = sst [smem:[#allocation52_spill]] %s5608_s21 }
  0x31   :  { %s5613_s29 = sld [smem:[%s6335_s0 + %s5444_s15]]  }
  0x32   :  { %s5618_s3 = sld [smem:[%s6335_s0 + %s5445_s22]]  }
  0x33   :  { %s5628_s21 = sld [smem:[%s6335_s0 + %s5447_s7]]  }
  0x35   :  { %6389 = sst [smem:[#allocation51_spill]] %s5603_s4 }
  0x36   :  { %s5623_s4 = sld [smem:[%s6335_s0 + %s5446_s28]]  }
  0x38   :  { %6391 = sst [smem:[#allocation53_spill]] %s5618_s3 }
  0x39   :  { %67 = vsyncpa [#allocation3], 0 }
  0x3a   :  { %68 = vsyncpa [#allocation6], 0 }
  0x3b   :  { %69 = vsyncpa [#allocation9], 0 }
  0x3c   :  { %70 = vsyncpa [#allocation12], 0 }
  0x3d   :  { %71 = vsyncpa [#allocation15], 0 }
  0x3e   :  { %72 = vsyncpa [#allocation4], 0 }
  0x3f   :  { %74 = vsyncpa [#allocation4 + $0x1], 0 }
  0x40   :  { %75 = vsyncpa [#allocation19], 0 }
  0x41   :  { %77 = vsyncpa [#allocation19 + $0x1], 0 }
  0x42   :  { %78 = vsyncpa [#allocation22], 0 }
  0x43   :  { %80 = vsyncpa [#allocation22 + $0x1], 0  ;;  %s5630_s15 = smov 0   ;;  %s5632_s16 = smov 0  }
  0x44   :  { %s5634_s18 = smov 0   ;;  %s5636_s22 = smov 0  }
  0x45 LB: > { %s6392_s17 = sld [smem:[#allocation34_spill]]  ;;  %s5651_s0 = sadd.s32 4294967295, %s5416_s22   ;;  %s5408_s16 = sphi %s5632_s16, %s6452_s16   ;;  %s5404_s15 = sphi %s5630_s15, %s6451_s15   ;;  %s5416_s22 = sphi %s5636_s22, %s6448_s22   ;;  %s5412_s18 = sphi %s5634_s18, %s6450_s18  }
  0x46   : > { %s6393_s3 = sld [smem:[#allocation53_spill]]  ;;  %s6345_s23 = sadd.s32 4294967294, %s5416_s22  }
  0x47   : > { %6394 = sst [smem:[#allocation54_spill]] %s5404_s15  ;;  %s5655_s26 = sadd.s32 1, %s5416_s22  }
  0x48   : > { %6395 = sst [smem:[#allocation55_spill]] %s5412_s18  ;;  %s675_s28 = sadd.s32 1, %s5412_s18 }
  0x49   : > { %6396 = sst [smem:[#allocation56_spill]] %s5416_s22  ;;  %s672_s1 = ssub.s32 %s5416_s22, %s5655_s26 }
  0x4a   : > { %6397 = sst [smem:[#allocation57_spill]] %s5655_s26  ;;  %p685_p0 = scmp.ne.s32.totalorder %s5412_s18, %s5408_s16 }
  0x4b   : > { %p673_p1 = scmp.eq.s32.totalorder %s672_s1, 0  ;;  %p686_p2 = scmp.eq.s32.totalorder %s5651_s0, 1 }
  0x4c   : > { %p691_p3 = scmp.ne.s32.totalorder %s5408_s16, %s5404_s15  ;;  %p692_p4 = scmp.eq.s32.totalorder %s6345_s23, 1 }
  0x4d   : > { %s5668_s2 = scalar_select %p673_p1, %s5412_s18, %s675_s28  }
  0x4e   : > { %p5670_p5 = por %p686_p2, %p685_p0  ;;  %p5674_p6 = por %p692_p4, %p691_p3 }
  0x4f   : > { %6398 = sst [smem:[#allocation58_spill]] %s5668_s2  ;;  %p4106_p7 = scmp.ge.s32.totalorder %s5416_s22, 1 }
  0x50   : > { %s6399_s7 = scalar_select %p5670_p5, 1, 0 }
  0x51   : > { %s6400_s10 = scalar_select %p5674_p6, 1, 0 }
  0x52   : > { %p777_p8 = scmp.lt.s32.totalorder %s5416_s22, 3  ;;  %p6351_p9 = scmp.eq.s32.totalorder %s5651_s0, 0 }
  0x53   : > { %6401 = sst [smem:[#allocation59_spill]] %s6400_s10  ;;  %s5448_s1 = smov [#allocation5]  }
  0x54   : > { %p5681_p10 = pnand %p4106_p7, %p777_p8  ;;  %s819_s23 = sshll.u32 %s5448_s1, 4  ;;  %s820_s23 = int_to_ptr.vmem [resolvable:$true] %s819_s23 }
  0x55   : > { %s5449_s28 = smov [#allocation8]   ;;  %s5450_s26 = smov [#allocation11]  }
  0x56   : > { %s6402_s11 = scalar_select %p5681_p10, 1, 0 }
  0x57   : > { %p4840_p11 = pneg %p5681_p10  ;;  %s847_s2 = sshll.u32 %s5449_s28, 4  ;;  %s848_s2 = int_to_ptr.vmem [resolvable:$true] %s847_s2 }
  0x58   : > { %s876_s10 = sshll.u32 %s5450_s26, 4  ;;  %s5027_s1 = scalar_lea.vmem %s820_s23, 16  ;;  %s877_s10 = int_to_ptr.vmem [resolvable:$true] %s876_s10 }
  0x59   : > { %p5689_p12 = pnand %p6351_p9, %p4840_p11  ;;  %p5028_p0 = scmp.ne.s32.totalorder %s820_s23, %s5027_s1 }
  0x5a   : > { %s5034_s28 = scalar_lea.vmem %s820_s23, 32  ;;  %p5035_p3 = scmp.lt.s32.totalorder %s820_s23, %s820_s23 }
  0x5b   : > { %p5695_p13 = pneg %p5689_p12  ;;  %p5036_p4 = scmp.lt.s32.totalorder %s5034_s28, %s5027_s1 }
  0x5d   : > { %p5030_p1 = pnand %p5028_p0, %p5695_p13  ;;  %p5037_p7 = por %p5036_p4, %p5035_p3 }
  0x5f   : > { %p5031_p2 = pneg %p5030_p1 }
  0x61   : > { %p5038_p8 = pnand %p5037_p7, %p5031_p2 }
  0x63   : > { %5041 = shalt.err (!%p5038_p8)
}
  0x64   : > { %s6405_s19 = sld [smem:[#allocation40_spill]]  ;;  %s5053_s26 = scalar_lea.vmem %s848_s2, 16 }
  0x65   : > { %p5054_p11 = scmp.ne.s32.totalorder %s848_s2, %s5053_s26  ;;  %s5060_s22 = scalar_lea.vmem %s848_s2, 32 }
  0x66   : > { %p5061_p5 = scmp.lt.s32.totalorder %s848_s2, %s848_s2  ;;  %p5062_p0 = scmp.lt.s32.totalorder %s5060_s22, %s5053_s26 }
  0x67   : > { %p5056_p9 = pnand %p5054_p11, %p5695_p13 }
  0x68   : > { %p5063_p1 = por %p5062_p0, %p5061_p5 }
  0x69   : > { %p5057_p6 = pneg %p5056_p9 }
  0x6a   : > { %4846 = dma.hbm_to_vmem [thread:$0]  (!%p5689_p12), %s6405_s19, 16, %s820_s23, [#allocation6]  }
  0x6b   : > { %p5064_p10 = pnand %p5063_p1, %p5057_p6 }
  0x6d   : > { %5067 = shalt.err (!%p5064_p10)
}
  0x6e   : > { %s6406_s12 = sld [smem:[#allocation43_spill]]  ;;  %s5079_s1 = scalar_lea.vmem %s877_s10, 64 }
  0x6f   : > { %p5080_p2 = scmp.ne.s32.totalorder %s877_s10, %s5079_s1  ;;  %p5087_p7 = scmp.lt.s32.totalorder %s877_s10, %s877_s10 }
  0x70   : > { %p5088_p8 = scmp.lt.s32.totalorder %s5079_s1, %s5079_s1 }
  0x71   : > { %p5082_p3 = pnand %p5080_p2, %p5695_p13 }
  0x72   : > { %p5089_p9 = por %p5088_p8, %p5087_p7 }
  0x73   : > { %p5083_p4 = pneg %p5082_p3 }
  0x74   : > { %4852 = dma.hbm_to_vmem [thread:$0]  (!%p5689_p12), %s6406_s12, 16, %s848_s2, [#allocation9]  }
  0x75   : > { %p5090_p11 = pnand %p5089_p9, %p5083_p4 }
  0x77   : > { %5093 = shalt.err (!%p5090_p11)
}
  0x78   : > { %s6356_s22 = smov 16   ;;  %s6407_s6 = sld [smem:[#allocation46_spill]] }
  0x79   : > { %s6358_s23 = smov 1   ;;  %s5453_s2 = smov [#allocation14]  }
  0x7a   : > { %s909_s28 = sshll.u32 %s5453_s2, 4  ;;  %s5454_s26 = smov [#allocation2]   ;;  %s910_s28 = int_to_ptr.vmem [resolvable:$true] %s909_s28 }
  0x7b   : > { %s805_s12 = sshll.u32 %s5454_s26, 4  ;;  %s5105_s19 = scalar_lea.vmem %s910_s28, 16  ;;  %s806_s12 = int_to_ptr.vmem [resolvable:$true] %s805_s12 }
  0x7c   : > { %p5106_p5 = scmp.ne.s32.totalorder %s910_s28, %s5105_s19  ;;  %s5112_s1 = scalar_lea.vmem %s910_s28, 32 }
  0x7d   : > { %p5113_p0 = scmp.lt.s32.totalorder %s910_s28, %s910_s28  ;;  %p5114_p1 = scmp.lt.s32.totalorder %s5112_s1, %s5105_s19 }
  0x7e   : > { %4858 = dma.hbm_to_vmem [thread:$0]  (!%p5689_p12), %s6407_s6, 64, %s877_s10, [#allocation12], %s6356_s22, %s6356_s22, %s6358_s23  }
  0x7f   : > { %p5108_p6 = pnand %p5106_p5, %p5695_p13  ;;  %p5115_p2 = por %p5114_p1, %p5113_p0 }
  0x81   : > { %p5109_p10 = pneg %p5108_p6 }
  0x83   : > { %p5116_p3 = pnand %p5115_p2, %p5109_p10 }
  0x85   : > { %5119 = shalt.err (!%p5116_p3)
}
  0x86   : > { %s6408_s14 = sld [smem:[#allocation49_spill]]  ;;  %s5131_s10 = scalar_lea.vmem %s806_s12, 16 }
  0x87   : > { %p5132_p4 = scmp.ne.s32.totalorder %s806_s12, %s5131_s10  ;;  %s5138_s2 = scalar_lea.vmem %s806_s12, 32 }
  0x88   : > { %p5139_p9 = scmp.lt.s32.totalorder %s806_s12, %s806_s12  ;;  %p5140_p11 = scmp.lt.s32.totalorder %s5138_s2, %s5131_s10 }
  0x89   : > { %p5134_p7 = pnand %p5132_p4, %p5695_p13 }
  0x8a   : > { %p5141_p5 = por %p5140_p11, %p5139_p9 }
  0x8b   : > { %p5135_p8 = pneg %p5134_p7 }
  0x8c   : > { %4864 = dma.hbm_to_vmem [thread:$0]  (!%p5689_p12), %s6408_s14, 16, %s910_s28, [#allocation15]  }
  0x8d   : > { %p5142_p6 = pnand %p5141_p5, %p5135_p8 }
  0x8f   : > { %5145 = shalt.err (!%p5142_p6)
}
  0x90   : > { %s6409_s8 = sld [smem:[#allocation38_spill]]  ;;  %s5455_s19 = smov [#allocation7]  }
  0x91   : > { %s833_s26 = sshll.u32 %s5455_s19, 4  ;;  %s5456_s28 = smov [#allocation10]   ;;  %s834_s26 = int_to_ptr.vmem [resolvable:$true] %s833_s26 }
  0x92   : > { %s860_s1 = sshll.u32 %s5456_s28, 4  ;;  %s5157_s22 = scalar_lea.vmem %s834_s26, 16  ;;  %s861_s1 = int_to_ptr.vmem [resolvable:$true] %s860_s1 }
  0x93   : > { %p5158_p10 = scmp.ne.s32.totalorder %s834_s26, %s5157_s22  ;;  %s5164_s23 = scalar_lea.vmem %s834_s26, 32 }
  0x94   : > { %p5165_p2 = scmp.lt.s32.totalorder %s834_s26, %s834_s26  ;;  %p5166_p3 = scmp.lt.s32.totalorder %s5164_s23, %s5157_s22 }
  0x95   : > { %p5160_p0 = pnand %p5158_p10, %p5695_p13 }
  0x96   : > { %4843 = dma.hbm_to_vmem [thread:$0]  (!%p5689_p12), %s6409_s8, 16, %s806_s12, [#allocation3]  }
  0x97   : > { %p5161_p1 = pneg %p5160_p0  ;;  %p5167_p4 = por %p5166_p3, %p5165_p2 }
  0x99   : > { %p5168_p7 = pnand %p5167_p4, %p5161_p1 }
  0x9b   : > { %5171 = shalt.err (!%p5168_p7)
}
  0x9c   : > { %4849 = dma.hbm_to_vmem [thread:$0]  (!%p5689_p12), %s5538_s30, 16, %s834_s26, [#allocation6]  }
  0x9d   : > { %s5183_s12 = scalar_lea.vmem %s861_s1, 64  ;;  %p5191_p5 = scmp.lt.s32.totalorder %s861_s1, %s861_s1 }
  0x9e   : > { %p5184_p8 = scmp.ne.s32.totalorder %s861_s1, %s5183_s12  ;;  %p5192_p6 = scmp.lt.s32.totalorder %s5183_s12, %s5183_s12 }
  0xa0   : > { %p5186_p9 = pnand %p5184_p8, %p5695_p13  ;;  %p5193_p10 = por %p5192_p6, %p5191_p5 }
  0xa2   : > { %p5187_p11 = pneg %p5186_p9 }
  0xa4   : > { %p5194_p0 = pnand %p5193_p10, %p5187_p11 }
  0xa6   : > { %5197 = shalt.err (!%p5194_p0)
}
  0xa7   : > { %s6410_s22 = smov 1   ;;  %s6411_s23 = smov 16  }
  0xa8   : > { %4855 = dma.hbm_to_vmem [thread:$0]  (!%p5689_p12), %s5558_s27, 64, %s861_s1, [#allocation9], %s6411_s23, %s6411_s23, %s6410_s22  }
  0xa9   : > { %s5457_s10 = smov [#allocation13]   ;;  %s5458_s19 = smov [#allocation16]  }
  0xaa   : > { %s892_s2 = sshll.u32 %s5457_s10, 4  ;;  %s919_s26 = sshll.u32 %s5458_s19, 4  ;;  %s893_s2 = int_to_ptr.vmem [resolvable:$true] %s892_s2  ;;  %s920_s26 = int_to_ptr.vmem [resolvable:$true] %s919_s26 }
  0xab   : > { %s5209_s28 = scalar_lea.vmem %s893_s2, 64  ;;  %p5217_p4 = scmp.lt.s32.totalorder %s893_s2, %s893_s2 }
  0xac   : > { %p5210_p1 = scmp.ne.s32.totalorder %s893_s2, %s5209_s28  ;;  %p5218_p7 = scmp.lt.s32.totalorder %s5209_s28, %s5209_s28 }
  0xae   : > { %p5212_p2 = pnand %p5210_p1, %p5695_p13  ;;  %p5219_p8 = por %p5218_p7, %p5217_p4 }
  0xb0   : > { %p5213_p3 = pneg %p5212_p2 }
  0xb2   : > { %p5220_p9 = pnand %p5219_p8, %p5213_p3 }
  0xb4   : > { %5223 = shalt.err (!%p5220_p9)
}
  0xb5   : > { %4861 = dma.hbm_to_vmem [thread:$0]  (!%p5689_p12), %s5578_s24, 64, %s893_s2, [#allocation12], %s6411_s23, %s6411_s23, %s6410_s22  }
  0xb6   : > { %s5235_s1 = scalar_lea.vmem %s920_s26, 512  ;;  %p5243_p10 = scmp.lt.s32.totalorder %s920_s26, %s920_s26 }
  0xb7   : > { %p5236_p11 = scmp.ne.s32.totalorder %s920_s26, %s5235_s1  ;;  %p5244_p0 = scmp.lt.s32.totalorder %s5235_s1, %s5235_s1 }
  0xb9   : > { %p5238_p5 = pnand %p5236_p11, %p5695_p13  ;;  %p5245_p1 = por %p5244_p0, %p5243_p10 }
  0xbb   : > { %p5239_p6 = pneg %p5238_p5 }
  0xbd   : > { %p5246_p2 = pnand %p5245_p1, %p5239_p6 }
  0xbf   : > { %5249 = shalt.err (!%p5246_p2)
}
  0xc0   : > { %s5459_s12 = smov 128   ;;  %s5460_s10 = smov 8  }
  0xc1   : > { %4867 = dma.hbm_to_vmem [thread:$0]  (!%p5689_p12), %s5593_s20, 512, %s920_s26, [#allocation15], %s5459_s12, %s5459_s12, %s5460_s10  }
  0xc2   : > { %p6412_p3 = scmp.ne.s32.totalorder %s6402_s11, 0 }
  0xc3   : > { %p6413_p4 = scmp.eq.s32.totalorder (!%p6412_p3), %s5651_s0, 0 }
  0xc4   : > { %967 = sbr.rel (%p6412_p3) target bundleno = 3706 (0xe7a), region = 128 }
  0xc9   : > { %5371 = dma.done.wait (%p6413_p4), [#allocation3], 16   ;;  %p6414_p13 = pmov %p6413_p4 }
  0xca   : > { %p6415_p7 = pmov %p6413_p4 }
  0xcb   : > { %5373 = vsyncadd (%p6414_p13), [#allocation3], 4294967280 }
  0xcc   : > { %5375 = dma.done.wait (%p6415_p7), [#allocation6], 32   ;;  %p6416_p8 = pmov %p6413_p4 }
  0xcd   : > { %p6417_p9 = pmov %p6413_p4 }
  0xce   : > { %5377 = vsyncadd (%p6416_p8), [#allocation6], 4294967264 }
  0xcf   : > { %5379 = dma.done.wait (%p6417_p9), [#allocation9], 80   ;;  %p6418_p12 = pmov %p6413_p4 }
  0xd0   : > { %p6419_p11 = pmov %p6413_p4 }
  0xd1   : > { %5381 = vsyncadd (%p6418_p12), [#allocation9], 4294967216 }
  0xd2   : > { %5383 = dma.done.wait (%p6419_p11), [#allocation12], 128   ;;  %p6420_p5 = pmov %p6413_p4 }
  0xd3   : > { %p6421_p6 = pmov %p6413_p4 }
  0xd4   : > { %5385 = vsyncadd (%p6420_p5), [#allocation12], 4294967168 }
  0xd5   : > { %5387 = dma.done.wait (%p6421_p6), [#allocation15], 528   ;;  %p6422_p10 = pmov %p6413_p4 }
  0xd6   : > { %s6423_s9 = sld [smem:[#allocation32_spill]]  ;;  %p1100_p0 = scmp.lt.s32.totalorder %s5651_s0, 1  ;;  %v5461_v0 = vmov 0.0   ;;  %vm5462_vm0 = vmmov 0   ;;  %v1227_v1 = vld [vmem:[%s5503_s25 + $0x18] sm:$0xff]  ;;  %v1226_v2 = vld [vmem:[%s5503_s25 + $0x10] sm:$0xff] }
  0xd7   : > { %5389 = vsyncadd (%p6422_p10), [#allocation15], 4294966768  ;;  %s6424_s13 = sld [smem:[#allocation33_spill]]  ;;  %4450 = vmatprep.subr.mxu0 %v5461_v0  ;;  %4458 = vmatprep.mubr.msk.f32.mxu0 %vm5462_vm0, %v5461_v0  ;;  %vm1150_vm1 = vcmask 261120   ;;  %v1225_v5 = vld [vmem:[%s5503_s25 + $0x8] sm:$0xff]  ;;  %v1224_v11 = vld [vmem:[%s5503_s25] sm:$0xff] }
  0xd8   : > { %s5780_s15 = scalar_select %p1100_p0, %s5651_s0, 1  ;;  %4461 = vmatprep.subr.mxu1 %v1227_v1  ;;  %v1142_v16 = vld [vmem:[%s6392_s17 + $0x18] sm:$0xff]  ;;  %v1141_v19 = vld [vmem:[%s6392_s17 + $0x10] sm:$0xff]  ;;  %v1140_v20 = vld [vmem:[%s6392_s17 + $0x8] sm:$0xff]  ;;  %vm1602_vm2 = vcmask 522240   ;;  %vm1614_vm3 = vcmask 523264  }
  0xd9   : > { %4462 = vmatpush3.msra.mxu1 %v1227_v1  ;;  %s6425_s5 = sld [smem:[#allocation31_spill]]  ;;  %4451 = vmatpush3.msra.mxu0 %v1142_v16  ;;  %v1139_v25 = vld [vmem:[%s6392_s17] sm:$0xff]  ;;  %s5463_s26 = smov 96   ;;  %vm2529_vm4 = vcmask 258049   ;;  %vm2006_vm5 = vcmask 56320   ;;  %vm2121_vm6 = vcmask 1046528  }
  0xda   : > { %s4273_s18 = sshll.u32 %s5780_s15, 6  ;;  %4463 = vmatprep.subr.mxu1 %v1226_v2  ;;  %s4130_s23 = sshll.u32 %s5780_s15, 3  ;;  %4452 = vmatprep.subr.mxu0 %v5461_v0  ;;  %vm3502_vm11 = vcmask 1040384   ;;  %vm3504_vm12 = vcmask 1041408   ;;  %vm3506_vm13 = vcmask 1042432   ;;  %vm3508_vm14 = vcmask 27648  }
  0xdb   : > { %4464 = vmatpush3.msra.mxu1 %v1226_v2  ;;  %4453 = vmatpush3.msra.mxu0 %v1141_v19  ;;  %s6426_s19 = sld [smem:[#allocation36_spill]]  ;;  %s5943_s15 = sand.u32 1, %s5408_s16  }
  0xdc   : > { %s5784_s11 = scalar_lea.vmem %s6423_s9, %s4273_s18  ;;  %4465 = vmatprep.subr.mxu1 %v1225_v5  ;;  %4454 = vmatprep.subr.mxu0 %v5461_v0  ;;  %s6427_s28 = sld [smem:[#allocation35_spill]] }
  0xdd   : > { %s5787_s22 = scalar_lea.vmem %s6424_s13, %s4273_s18  ;;  %v5792_v3 = vld [vmem:[%s5784_s11] sm:$0xff]  ;;  %v5798_v7 = vld [vmem:[%s5784_s11 + $0x8] sm:$0xff]  ;;  %v5802_v9 = vld [vmem:[%s5784_s11 + $0x10] sm:$0xff]  ;;  %4466 = vmatpush3.msra.mxu1 %v1225_v5  ;;  %4455 = vmatpush3.msra.mxu0 %v1140_v20  ;;  %s6428_s1 = sld [smem:[#allocation37_spill]] }
  0xde   : > { %v1123_v4 = vld [vmem:[%s5787_s22] sm:$0xff]  ;;  %v1124_v8 = vld [vmem:[%s5787_s22 + $0x8] sm:$0xff]  ;;  %v1125_v10 = vld [vmem:[%s5787_s22 + $0x10] sm:$0xff]  ;;  %4467 = vmatprep.subr.mxu1 %v1224_v11  ;;  %4456 = vmatprep.subr.mxu0 %v5461_v0  ;;  %s6429_s12 = sld [smem:[#allocation39_spill]]  ;;  %s6360_s18 = sshll.u32 %s5943_s15, 2 }
  0xdf   : > { %v1131_v6 = vadd.f32 %v1123_v4, %v5792_v3  ;;  %v1132_v12 = vadd.f32 %v1124_v8, %v5798_v7  ;;  %v1133_v13 = vadd.f32 %v1125_v10, %v5802_v9  ;;  %v5811_v14 = vld [vmem:[%s5784_s11 + $0x18] sm:$0xff]  ;;  %v5816_v17 = vld [vmem:[%s5784_s11 + $0x20] sm:$0xff]  ;;  %4468 = vmatpush3.msra.mxu1 %v1224_v11  ;;  %s1103_s2 = scalar_lea.vmem %s6425_s5, %s4130_s23  ;;  %v5828_v23 = vld [vmem:[%s5784_s11 + $0x28] sm:$0xff]  ;;  %4457 = vmatpush3.msra.mxu0 %v1139_v25  ;;  %s6430_s10 = sld [smem:[#allocation41_spill]] }
  0xe0   : > { %v1126_v15 = vld [vmem:[%s5787_s22 + $0x18] sm:$0xff]  ;;  %v1127_v18 = vld [vmem:[%s5787_s22 + $0x20] sm:$0xff]  ;;  %v1128_v24 = vld [vmem:[%s5787_s22 + $0x28] sm:$0xff]  ;;  %4501 = vmatprep.subr.mxu1 %v5461_v0  ;;  %s3750_s6 = sand.u32 1, %s5651_s0   ;;  %p6441_p2 = scmp.ne.s32.totalorder %s6399_s7, 0 }
  0xe1   : > { %4469 = vmatprep.mubr.msk.f32.mxu1 %vm1150_vm1, %v1131_v6  ;;  %v1134_v21 = vadd.f32 %v1126_v15, %v5811_v14  ;;  %v1135_v22 = vadd.f32 %v1127_v18, %v5816_v17  ;;  %v5834_v26 = vld [vmem:[%s5784_s11 + $0x30] sm:$0xff]  ;;  %v5837_v28 = vld [vmem:[%s1103_s2] sm:$0x7f]  ;;  %v1136_v29 = vadd.f32 %v1128_v24, %v5828_v23  ;;  %v5846_v31 = vld [vmem:[%s5784_s11 + $0x38] sm:$0xff]  ;;  %s5953_s11 = scalar_lea.vmem [#allocation17], %s6360_s18  ;;  %s6433_s2 = sld [smem:[#allocation44_spill]] }
  0xe2   : > { %4470 = vmatmul.mubr.msk.f32.vlgmr.msra.gmra.mxu1 %vm1150_vm1, %v1132_v12  ;;  %v1129_v27 = vld [vmem:[%s5787_s22 + $0x30] sm:$0xff]  ;;  %v1130_v32 = vld [vmem:[%s5787_s22 + $0x38] sm:$0xff]  ;;  %4459 = vmatmul.mubr.msk.f32.vlgmr.msra.gmra.mxu0 %vm1150_vm1, %v5837_v28  ;;  %v4137_v35 = vld [vmem:[%s6426_s19] ss:$0 sm:$0xff]  ;;  %s6431_s22 = sld [smem:[#allocation42_spill]] }
  0xe3   : > { %4472 = vmatprep.mubr.msk.f32.mxu1 %vm1150_vm1, %v1133_v13  ;;  %v1137_v30 = vadd.f32 %v1129_v27, %v5834_v26  ;;  %4489 = vmatprep.mubr.msk.f32.mxu0 %vm1150_vm1, %v5792_v3  ;;  %v1138_v33 = vadd.f32 %v1130_v32, %v5846_v31  ;;  %v4135_v53 = vld [vmem:[%s6427_s28] ss:$0 sm:$0xff]  ;;  %v1367_v55 = vld [vmem:[%s6428_s1 + $0x18] sm:$0xff]  ;;  %v1366_v56 = vld [vmem:[%s6428_s1 + $0x10] sm:$0xff]  ;;  %s6434_s19 = sld [smem:[#allocation45_spill]]  ;;  %s4128_s28 = sshll.u32 %s5943_s15, 5 }
  0xe4   : > { %4481 = vmatprep.subr.mxu0 %v1367_v55  ;;  %v1365_v57 = vld [vmem:[%s6428_s1 + $0x8] sm:$0xff]  ;;  %v1364_v58 = vld [vmem:[%s6428_s1] sm:$0xff]  ;;  %s6437_s18 = sld [smem:[#allocation51_spill]] }
  0xe5   : > { %4482 = vmatpush3.msra.mxu0 %v1367_v55  ;;  %v4146_v8 = vld [vmem:[#allocation2] ss:$0 sm:$0xff] }
  0xe6   : > { %4473 = vmatmul.mubr.msk.f32.gmra.mxu1 %vm1150_vm1, %v1134_v21  ;;  %4483 = vmatprep.subr.mxu0 %v1366_v56 }
  0xe7   : > { %4475 = vmatprep.mubr.msk.f32.mxu1 %vm1150_vm1, %v1135_v22  ;;  %4484 = vmatpush3.msra.mxu0 %v1366_v56 }
  0xe8   : > { %4485 = vmatprep.subr.mxu0 %v1365_v57  ;;  %s6432_s23 = smov %s6431_s22 }
  0xe9   : > { %4486 = vmatpush3.msra.mxu0 %v1365_v57 }
  0xea   : > { %4476 = vmatmul.mubr.msk.f32.gmra.mxu1 %vm1150_vm1, %v1136_v29  ;;  %4487 = vmatprep.subr.mxu0 %v1364_v58  ;;  %s6438_s1 = smov %s6437_s18 }
  0xeb   : > { %4478 = vmatprep.mubr.msk.f32.mxu1 %vm1150_vm1, %v1137_v30  ;;  %4488 = vmatpush3.msra.mxu0 %v1364_v58 }
  0xec   : > { %4490 = vmatmul.mubr.msk.f32.vlgmr.msra.gmra.mxu0 %vm1150_vm1, %v5798_v7  ;;  %4520 = vmatprep.subr.mxu0 %v5461_v0 }
  0xed   : > { %4492 = vmatprep.mubr.msk.f32.mxu0 %vm1150_vm1, %v5802_v9 }
  0xee   : > { %4479 = vmatmul.mubr.msk.f32.gmra.mxu1 %vm1150_vm1, %v1138_v33 }
  0xef   : > { %4517 = vmatprep.mubr.msk.f32.mxu1 %vm5462_vm0, %v5461_v0 }
  0xf0   : > { %4493 = vmatmul.mubr.msk.f32.gmra.mxu0 %vm1150_vm1, %v5811_v14 }
  0xf1   : > { %4495 = vmatprep.mubr.msk.f32.mxu0 %vm1150_vm1, %v5816_v17 }
  0xf4   : > { %4496 = vmatmul.mubr.msk.f32.gmra.mxu0 %vm1150_vm1, %v5828_v23 }
  0xf5   : > { %4498 = vmatprep.mubr.msk.f32.mxu0 %vm1150_vm1, %v5834_v26 }
  0xf8   : > { %4499 = vmatmul.mubr.msk.f32.gmra.mxu0 %vm1150_vm1, %v5846_v31 }
  0xf9   : > { %4536 = vmatprep.mubr.msk.f32.mxu0 %vm5462_vm0, %v5461_v0 }
 0x1a2   : > { %v4471_v34 = vpop.f32.mrf.mxu1  ;;  %v1220_v39 = vpop.f32.mrf.mxu0 }
 0x1a3   : > { %v1331_v41 = vadd.f32 %v4471_v34, %v4137_v35  ;;  %v1221_v54 = vadd.f32 %v4135_v53, %v1220_v39  ;;  %v1777_v39 = vld [vmem:[%s6430_s10 + $0x18] sm:$0xff] }
 0x1a4   : > { %v1325_v36 = vpop.f32.mrf.mxu1  ;;  %v4460_v42 = vpop.f32.mrf.mxu0 }
 0x1a5   : > { %v1326_v37 = vadd.f32 %v4137_v35, %v1325_v36  ;;  %v1690_v36 = vld [vmem:[%s6429_s12 + $0x10] sm:$0xff] }
 0x1a6   : > { %v4474_v38 = vpop.f32.mrf.mxu1  ;;  %v1776_v42 = vld [vmem:[%s6430_s10 + $0x10] sm:$0xff] }
 0x1a7   : > { %1858 = vrot.lane.b32.xlu1 %v1326_v37, %s5463_s26  ;;  %v1341_v45 = vadd.f32 %v4474_v38, %v4137_v35  ;;  %v1688_v38 = vld [vmem:[%s6429_s12] sm:$0xff] }
 0x1a8   : > { %v1335_v40 = vpop.f32.mrf.mxu1 }
 0x1a9   : > { %v5877_v52 = vadd.f32 %v4137_v35, %v1335_v40 }
 0x1aa   : > { %v4477_v43 = vpop.f32.mrf.mxu1 }
 0x1ab   : > { %1860 = vrot.lane.b32.xlu1 %v1331_v41, %s5463_s26  ;;  %v1351_v51 = vadd.f32 %v4477_v43, %v4137_v35  ;;  %v1775_v43 = vld [vmem:[%s6430_s10 + $0x8] sm:$0xff] }
 0x1ac   : > { %v1345_v44 = vpop.f32.mrf.mxu1  ;;  %v4491_v1 = vpop.f32.mrf.mxu0 }
 0x1ad   : > { %v1346_v49 = vadd.f32 %v4137_v35, %v1345_v44  ;;  %v1471_v21 = vadd.f32 %v4491_v1, %v4146_v8  ;;  %v1774_v44 = vld [vmem:[%s6430_s10] sm:$0xff]  ;;  %s5464_s10 = smov [#allocation18]  }
 0x1ae   : > { %v4480_v46 = vpop.f32.mrf.mxu1  ;;  %v1465_v2 = vpop.f32.mrf.mxu0 }
 0x1af   : > { %v1361_v47 = vadd.f32 %v4480_v46, %v4137_v35  ;;  %1864 = vrot.lane.b32.xlu1 %v1341_v45, %s5463_s26  ;;  %v1466_v22 = vadd.f32 %v4146_v8, %v1465_v2  ;;  %v4166_v46 = vld [vmem:[#allocation5] ss:$0 sm:$0xff] }
 0x1b0   : > { %v1355_v48 = vpop.f32.mrf.mxu1  ;;  %v4494_v4 = vpop.f32.mrf.mxu0 }
 0x1b1   : > { %4502 = vmatpush3.xpose.msk.msra.mxu1 %vm1150_vm1, %v1361_v47  ;;  %v1356_v50 = vadd.f32 %v4137_v35, %v1355_v48  ;;  %v1481_v19 = vadd.f32 %v4494_v4, %v4146_v8  ;;  %v1691_v35 = vld [vmem:[%s6429_s12 + $0x18] sm:$0xff] }
 0x1b2   : > { %4503 = vmatprep.subr.mxu1 %v5461_v0  ;;  %v1475_v5 = vpop.f32.mrf.mxu0 }
 0x1b3   : > { %1866 = vrot.lane.b32.xlu1 %v1346_v49, %s5463_s26  ;;  %v1476_v20 = vadd.f32 %v4146_v8, %v1475_v5 }
 0x1b4   : > { %v4497_v6 = vpop.f32.mrf.mxu0 }
 0x1b5   : > { %4504 = vmatpush3.xpose.msk.msra.mxu1 %vm1150_vm1, %v1356_v50  ;;  %v1491_v15 = vadd.f32 %v4497_v6, %v4146_v8 }
 0x1b6   : > { %4505 = vmatprep.subr.mxu1 %v5461_v0  ;;  %v1485_v10 = vpop.f32.mrf.mxu0 }
 0x1b7   : > { %1868 = vrot.lane.b32.xlu1 %v1351_v51, %s5463_s26  ;;  %v1486_v18 = vadd.f32 %v4146_v8, %v1485_v10 }
 0x1b8   : > { %v4500_v11 = vpop.f32.mrf.mxu0 }
 0x1b9   : > { %4506 = vmatpush3.xpose.msk.msra.mxu1 %vm1150_vm1, %v1351_v51  ;;  %v1501_v12 = vadd.f32 %v4500_v11, %v4146_v8 }
 0x1ba   : > { %4507 = vmatprep.subr.mxu1 %v5461_v0  ;;  %v1495_v13 = vpop.f32.mrf.mxu0 }
 0x1bb   : > { %1870 = vrot.lane.b32.xlu1 %v1356_v50, %s5463_s26  ;;  %v1496_v16 = vadd.f32 %v4146_v8, %v1495_v13  ;;  %4521 = vmatpush3.msra.mxu0 %v1501_v12 }
 0x1bc   : > { %4522 = vmatprep.subr.mxu0 %v5461_v0 }
 0x1bd   : > { %4508 = vmatpush3.xpose.msk.msra.mxu1 %vm1150_vm1, %v1346_v49  ;;  %4523 = vmatpush3.msra.mxu0 %v1496_v16 }
 0x1be   : > { %4509 = vmatprep.subr.mxu1 %v5461_v0  ;;  %4524 = vmatprep.subr.mxu0 %v5461_v0 }
 0x1bf   : > { %1872 = vrot.lane.b32.xlu1 %v1361_v47, %s5463_s26  ;;  %4525 = vmatpush3.msra.mxu0 %v1491_v15 }
 0x1c0   : > { %4526 = vmatprep.subr.mxu0 %v5461_v0 }
 0x1c1   : > { %4510 = vmatpush3.xpose.msk.msra.mxu1 %vm1150_vm1, %v1341_v45  ;;  %4527 = vmatpush3.msra.mxu0 %v1486_v18 }
 0x1c2   : > { %4511 = vmatprep.subr.mxu1 %v5461_v0  ;;  %4528 = vmatprep.subr.mxu0 %v5461_v0 }
 0x1c3   : > { %4529 = vmatpush3.msra.mxu0 %v1481_v19 }
 0x1c4   : > { %4530 = vmatprep.subr.mxu0 %v5461_v0 }
 0x1c5   : > { %4512 = vmatpush3.xpose.msk.msra.mxu1 %vm1150_vm1, %v5877_v52  ;;  %4531 = vmatpush3.msra.mxu0 %v1476_v20 }
 0x1c6   : > { %4513 = vmatprep.subr.mxu1 %v5461_v0  ;;  %4532 = vmatprep.subr.mxu0 %v5461_v0 }
 0x1c7   : > { %4533 = vmatpush3.msra.mxu0 %v1471_v21 }
 0x1c8   : > { %4534 = vmatprep.subr.mxu0 %v5461_v0 }
 0x1c9   : > { %4514 = vmatpush3.xpose.msk.msra.mxu1 %vm1150_vm1, %v1331_v41  ;;  %4535 = vmatpush3.msra.mxu0 %v1466_v22 }
 0x1ca   : > { %4515 = vmatprep.subr.mxu1 %v5461_v0  ;;  %4539 = vmatprep.subr.mxu0 %v5461_v0 }
 0x1cd   : > { %4516 = vmatpush3.xpose.msk.msra.mxu1 %vm1150_vm1, %v1326_v37  ;;  %v1689_v37 = vld [vmem:[%s6429_s12 + $0x8] sm:$0xff]  ;;  %s5254_s12 = sshll.u32 %s5464_s10, 4  ;;  %s5255_s12 = int_to_ptr.vmem [resolvable:$false] %s5254_s12 }
 0x1d0   : > { %4518 = vmatmul.mubr.msk.f32.vlgmr.msra.gmra.mxu1 %vm1150_vm1, %v1221_v54 }
 0x219   : > { %v1859_v59 = vpop.permute.xlu1 %1858 }
 0x21a   : > { %4563 = vmatprep.mubr.msk.f32.mxu1 %vm1150_vm1, %v1859_v59 }
 0x21d   : > { %v1861_v50 = vpop.permute.xlu1 %1860 }
 0x221   : > { %v1865_v51 = vpop.permute.xlu1 %1864 }
 0x225   : > { %v1867_v53 = vpop.permute.xlu1 %1866 }
 0x229   : > { %v1869_v56 = vpop.permute.xlu1 %1868 }
 0x22d   : > { %v1871_v58 = vpop.permute.xlu1 %1870 }
 0x231   : > { %v1873_v59 = vpop.permute.xlu1 %1872 }
 0x290   : > { %v1597_v60 = vpop.f32.mrf.mxu1 }
 0x291   : > { %v1601_v61 = vmul.f32 0.17677669, %v1597_v60 }
 0x292   : > { %v4519_v62 = vpop.f32.mrf.mxu1 }
 0x293   : > { %v1603_v63 = vsel %vm1602_vm2, %v1601_v61, -inf }
 0x294   : > { %1604 = vmax.xlane.f32.xlu0 %v1603_v63 }
 0x31d   : > { %v1605_v24 = vpop.xlane.xlu0 %1604 }
 0x31e   : > { %v1606_v25 = vsub.f32 %v1601_v61, %v1605_v24 }
 0x320   : > { %v1607_v27 = vmul.f32 1.442695, %v1606_v25 }
 0x322   : > { %4980 = vpow2.f32 %v1607_v27 }
 0x32f   : > { %v4981_v29 = vpop.eup %4980 }
 0x330   : > { %v1609_v30 = vsel %vm1602_vm2, %v4981_v29, 0.0 }
 0x331   : > { %1610 = vadd.xlane.f32.xlu0 %v1609_v30 }
 0x347   : > { %1862 = vrot.lane.b32.xlu0 %v5877_v52, %s5463_s26  ;;  %v4167_v52 = vld [vmem:[#allocation7] ss:$0 sm:$0xff] }
 0x3ba   : > { %v1611_v32 = vpop.xlane.xlu0 %1610 }
 0x3bb   : > { %4982 = vrcp.f32 %v1611_v32 }
 0x3be   : > { %v1863_v57 = vpop.permute.xlu0 %1862 }
 0x3c8   : > { %v4983_v33 = vpop.eup %4982 }
 0x3c9   : > { %v1613_v34 = vmul.f32 %v4983_v33, %v4981_v29 }
 0x3cb   : > { %4537 = vmatmul.mubr.msk.f32.vlgmr.msra.gmra.mxu0 %vm1614_vm3, %v1613_v34 }
 0x3cc   : > { %4540 = vmatpush3.msra.mxu0 %v1691_v35  ;;  %4547 = vmatprep.mubr.msk.f32.mxu0 %vm5462_vm0, %v5461_v0 }
 0x3cd   : > { %4541 = vmatprep.subr.mxu0 %v5461_v0 }
 0x3ce   : > { %4542 = vmatpush3.msra.mxu0 %v1690_v36 }
 0x3cf   : > { %4543 = vmatprep.subr.mxu0 %v5461_v0 }
 0x3d0   : > { %4544 = vmatpush3.msra.mxu0 %v1689_v37 }
 0x3d1   : > { %4545 = vmatprep.subr.mxu0 %v5461_v0 }
 0x3d2   : > { %4546 = vmatpush3.msra.mxu0 %v1688_v38 }
 0x3d3   : > { %4550 = vmatprep.subr.mxu0 %v5461_v0 }
 0x48b   : > { %v1684_v40 = vpop.f32.mrf.mxu0 }
 0x48c   : > { %4548 = vmatmul.mubr.msk.f32.vlgmr.msra.gmra.mxu0 %vm1150_vm1, %v1684_v40 }
 0x48d   : > { %v4538_v41 = vpop.f32.mrf.mxu0  ;;  %4551 = vmatpush3.msra.mxu0 %v1777_v39  ;;  %4558 = vmatprep.mubr.msk.f32.mxu0 %vm5462_vm0, %v5461_v0 }
 0x48e   : > { %4552 = vmatprep.subr.mxu0 %v5461_v0 }
 0x48f   : > { %4553 = vmatpush3.msra.mxu0 %v1776_v42 }
 0x490   : > { %4554 = vmatprep.subr.mxu0 %v5461_v0 }
 0x491   : > { %4555 = vmatpush3.msra.mxu0 %v1775_v43 }
 0x492   : > { %4556 = vmatprep.subr.mxu0 %v5461_v0 }
 0x493   : > { %4557 = vmatpush3.msra.mxu0 %v1774_v44 }
 0x54c   : > { %v1761_v45 = vpop.f32.mrf.mxu0 }
 0x54d   : > { %v1765_v47 = vadd.f32 %v1761_v45, %v5837_v28 }
 0x54e   : > { %v4549_v48 = vpop.f32.mrf.mxu0 }
 0x54f   : > { %v5947_v49 = vadd.f32 %v4166_v46, %v1765_v47 }
 0x551   : > { %4559 = vmatmul.mubr.msk.f32.vlgmr.msra.gmra.mxu0 %vm1150_vm1, %v5947_v49  ;;  %2530 = vst.msk [vmem:[%s5953_s11 - $0x1] sm:$0x1e] %vm2529_vm4, %v5947_v49 }
 0x611   : > { %v1854_v54 = vpop.f32.mrf.mxu0 }
 0x612   : > { %v5957_v55 = vadd.f32 %v4167_v52, %v1854_v54 }
 0x613   : > { %v4560_v28 = vpop.f32.mrf.mxu0 }
 0x614   : > { %4561 = vmatprep.subr.msk.mxu1 %vm1150_vm1, %v5957_v55 }
 0x615   : > { %4562 = vmatpush3.xpose.msk.msra.mxu1 %vm1150_vm1, %v5957_v55 }
 0x618   : > { %4564 = vmatmul.mubr.msk.f32.vlgmr.msra.gmra.mxu1 %vm1150_vm1, %v1861_v50 }
 0x619   : > { %4566 = vmatprep.mubr.msk.f32.mxu1 %vm1150_vm1, %v1863_v57 }
 0x61c   : > { %4567 = vmatmul.mubr.msk.f32.gmra.mxu1 %vm1150_vm1, %v1865_v51 }
 0x61d   : > { %4569 = vmatprep.mubr.msk.f32.mxu1 %vm1150_vm1, %v1867_v53 }
 0x620   : > { %4570 = vmatmul.mubr.msk.f32.gmra.mxu1 %vm1150_vm1, %v1869_v56 }
 0x621   : > { %4572 = vmatprep.mubr.msk.f32.mxu1 %vm1150_vm1, %v1871_v58 }
 0x624   : > { %4573 = vmatmul.mubr.msk.f32.gmra.mxu1 %vm1150_vm1, %v1873_v59 }
 0x6d8   : > { %v4565_v60 = vpop.f32.mrf.mxu1 }
 0x6d9   : > { %v1999_v61 = vmul.f32 0.17677669, %v4565_v60 }
 0x6da   : > { %v1959_v62 = vpop.f32.mrf.mxu1 }
 0x6db   : > { %v1998_v63 = vmul.f32 0.17677669, %v1959_v62  ;;  %v2010_v1 = vsel %vm2006_vm5, %v1999_v61, -inf }
 0x6dc   : > { %2011 = vmax.xlane.f32.xlu0 %v2010_v1  ;;  %v4568_v2 = vpop.f32.mrf.mxu1 }
 0x6dd   : > { %v2001_v4 = vmul.f32 0.17677669, %v4568_v2  ;;  %v2007_v5 = vsel %vm2006_vm5, %v1998_v63, -inf }
 0x6de   : > { %2008 = vmax.xlane.f32.xlu1 %v2007_v5  ;;  %v1969_v6 = vpop.f32.mrf.mxu1 }
 0x6df   : > { %v2000_v8 = vmul.f32 0.17677669, %v1969_v6  ;;  %v2016_v12 = vsel %vm2006_vm5, %v2001_v4, -inf }
 0x6e0   : > { %v4571_v10 = vpop.f32.mrf.mxu1 }
 0x6e1   : > { %v2003_v11 = vmul.f32 0.17677669, %v4571_v10  ;;  %v2013_v13 = vsel %vm2006_vm5, %v2000_v8, -inf }
 0x6e2   : > { %2017 = vmax.xlane.f32.xlu1 %v2016_v12  ;;  %2014 = vmax.xlane.f32.xlu0 %v2013_v13  ;;  %v1979_v15 = vpop.f32.mrf.mxu1  ;;  %v2231_v12 = vld [vmem:[%s6432_s23 + $0x10] sm:$0xff]  ;;  %v2230_v13 = vld [vmem:[%s6432_s23 + $0x8] sm:$0xff] }
 0x6e3   : > { %v2002_v16 = vmul.f32 0.17677669, %v1979_v15  ;;  %v2022_v20 = vsel %vm2006_vm5, %v2003_v11, -inf }
 0x6e4   : > { %v4574_v18 = vpop.f32.mrf.mxu1 }
 0x6e5   : > { %v2005_v19 = vmul.f32 0.17677669, %v4574_v18  ;;  %v2019_v21 = vsel %vm2006_vm5, %v2002_v16, -inf }
 0x6e6   : > { %2023 = vmax.xlane.f32.xlu1 %v2022_v20  ;;  %2020 = vmax.xlane.f32.xlu0 %v2019_v21  ;;  %v1989_v22 = vpop.f32.mrf.mxu1 }
 0x6e7   : > { %v2004_v24 = vmul.f32 0.17677669, %v1989_v22  ;;  %v2028_v25 = vsel %vm2006_vm5, %v2005_v19, -inf }
 0x6e9   : > { %v2025_v27 = vsel %vm2006_vm5, %v2004_v24, -inf }
 0x6ea   : > { %2029 = vmax.xlane.f32.xlu1 %v2028_v25  ;;  %2026 = vmax.xlane.f32.xlu0 %v2025_v27 }
 0x765   : > { %v2012_v29 = vpop.xlane.xlu0 %2011 }
 0x766   : > { %v2032_v30 = vsub.f32 %v1999_v61, %v2012_v29 }
 0x767   : > { %v2009_v32 = vpop.xlane.xlu1 %2008 }
 0x768   : > { %v2041_v33 = vmul.f32 1.442695, %v2032_v30  ;;  %v2031_v34 = vsub.f32 %v1998_v63, %v2009_v32 }
 0x76a   : > { %4984 = vpow2.f32 %v2041_v33  ;;  %v2039_v35 = vmul.f32 1.442695, %v2031_v34 }
 0x76b   : > { %v2018_v36 = vpop.xlane.xlu1 %2017  ;;  %v2015_v37 = vpop.xlane.xlu0 %2014 }
 0x76c   : > { %4986 = vpow2.f32 %v2039_v35  ;;  %v2034_v38 = vsub.f32 %v2001_v4, %v2018_v36  ;;  %v2033_v39 = vsub.f32 %v2000_v8, %v2015_v37 }
 0x76e   : > { %v2045_v40 = vmul.f32 1.442695, %v2034_v38  ;;  %v2043_v41 = vmul.f32 1.442695, %v2033_v39 }
 0x76f   : > { %v2024_v42 = vpop.xlane.xlu1 %2023  ;;  %v2021_v43 = vpop.xlane.xlu0 %2020 }
 0x770   : > { %4988 = vpow2.f32 %v2045_v40  ;;  %v2036_v44 = vsub.f32 %v2003_v11, %v2024_v42  ;;  %v2035_v45 = vsub.f32 %v2002_v16, %v2021_v43  ;;  %v2232_v11 = vld [vmem:[%s6431_s22 + $0x18] sm:$0xff]  ;;  %s6128_s22 = scalar_lea.vmem [#allocation18], %s4128_s28  ;;  %s6436_s28 = sld [smem:[#allocation48_spill]] }
 0x771   : > { %4990 = vpow2.f32 %v2043_v41  ;;  %4589 = vmatprep.subr.mxu1 %v2232_v11 }
 0x772   : > { %v2049_v46 = vmul.f32 1.442695, %v2036_v44  ;;  %v2047_v47 = vmul.f32 1.442695, %v2035_v45  ;;  %4590 = vmatpush3.msra.mxu1 %v2232_v11  ;;  %v2229_v44 = vld [vmem:[%s6432_s23] sm:$0xff] }
 0x773   : > { %v2030_v48 = vpop.xlane.xlu1 %2029  ;;  %v2027_v50 = vpop.xlane.xlu0 %2026  ;;  %4591 = vmatprep.subr.mxu1 %v2231_v12 }
 0x774   : > { %4992 = vpow2.f32 %v2049_v46  ;;  %v2038_v51 = vsub.f32 %v2005_v19, %v2030_v48  ;;  %v2037_v52 = vsub.f32 %v2004_v24, %v2027_v50  ;;  %4592 = vmatpush3.msra.mxu1 %v2231_v12  ;;  %v2533_v50 = vld [vmem:[%s6433_s2 + $0x10] sm:$0xff] }
 0x775   : > { %4994 = vpow2.f32 %v2047_v47  ;;  %4593 = vmatprep.subr.mxu1 %v2230_v13  ;;  %v2534_v47 = vld [vmem:[%s6433_s2 + $0x18] sm:$0xff] }
 0x776   : > { %v2053_v53 = vmul.f32 1.442695, %v2038_v51  ;;  %v2051_v54 = vmul.f32 1.442695, %v2037_v52  ;;  %4594 = vmatpush3.msra.mxu1 %v2230_v13  ;;  %v2532_v52 = vld [vmem:[%s6433_s2 + $0x8] sm:$0xff] }
 0x777   : > { %v4985_v28 = vpop.eup %4984  ;;  %4595 = vmatprep.subr.mxu1 %v2229_v44 }
 0x778   : > { %4996 = vpow2.f32 %v2053_v53  ;;  %v2058_v56 = vsel %vm2006_vm5, %v4985_v28, 0.0  ;;  %4596 = vmatpush3.msra.mxu1 %v2229_v44 }
 0x779   : > { %v4987_v57 = vpop.eup %4986  ;;  %4998 = vpow2.f32 %v2051_v54  ;;  %2059 = vadd.xlane.f32.xlu1 %v2058_v56  ;;  %4631 = vmatprep.subr.mxu1 %v5461_v0  ;;  %v2531_v54 = vld [vmem:[%s6433_s2] sm:$0xff] }
 0x77a   : > { %v2055_v58 = vsel %vm2006_vm5, %v4987_v57, 0.0 }
 0x77b   : > { %2056 = vadd.xlane.f32.xlu0 %v2055_v58  ;;  %v2536_v58 = vrot.slane %v5947_v49, 1 }
 0x77d   : > { %v4989_v59 = vpop.eup %4988 }
 0x77e   : > { %v4991_v60 = vpop.eup %4990  ;;  %v2064_v61 = vsel %vm2006_vm5, %v4989_v59, 0.0 }
 0x77f   : > { %2065 = vadd.xlane.f32.xlu1 %v2064_v61  ;;  %v2061_v62 = vsel %vm2006_vm5, %v4991_v60, 0.0  ;;  %v2611_v61 = vld [vmem:[%s6434_s19 + $0x8] sm:$0xff] }
 0x780   : > { %2062 = vadd.xlane.f32.xlu0 %v2061_v62  ;;  %v2610_v62 = vld [vmem:[%s6434_s19] sm:$0xff] }
 0x781   : > { %v4993_v63 = vpop.eup %4992 }
 0x782   : > { %v4995_v1 = vpop.eup %4994  ;;  %v2070_v2 = vsel %vm2006_vm5, %v4993_v63, 0.0 }
 0x783   : > { %2071 = vadd.xlane.f32.xlu1 %v2070_v2  ;;  %v2067_v4 = vsel %vm2006_vm5, %v4995_v1, 0.0 }
 0x784   : > { %2068 = vadd.xlane.f32.xlu0 %v2067_v4 }
 0x785   : > { %v4997_v5 = vpop.eup %4996 }
 0x786   : > { %v4999_v6 = vpop.eup %4998  ;;  %v2076_v8 = vsel %vm2006_vm5, %v4997_v5, 0.0 }
 0x787   : > { %2077 = vadd.xlane.f32.xlu1 %v2076_v8  ;;  %v2073_v10 = vsel %vm2006_vm5, %v4999_v6, 0.0 }
 0x788   : > { %2074 = vadd.xlane.f32.xlu0 %v2073_v10 }
 0x79e   : > { %2095 = vrot.lane.b32.xlu0 %v5957_v55, %s5463_s26  ;;  %s6435_s26 = sld [smem:[#allocation47_spill]] }
 0x7a4   : > { %v2691_v44 = vld [vmem:[%s6435_s26 + $0x10] sm:$0xff] }
 0x802   : > { %v2060_v15 = vpop.xlane.xlu1 %2059 }
 0x804   : > { %v2057_v16 = vpop.xlane.xlu0 %2056 }
 0x805   : > { %5000 = vrcp.f32 %v2057_v16  ;;  %v4195_v16 = vld [vmem:[#allocation8] ss:$0 sm:$0xff] }
 0x806   : > { %5002 = vrcp.f32 %v2060_v15 }
 0x808   : > { %v2066_v18 = vpop.xlane.xlu1 %2065 }
 0x809   : > { %5004 = vrcp.f32 %v2066_v18  ;;  %v2063_v19 = vpop.xlane.xlu0 %2062 }
 0x80a   : > { %5006 = vrcp.f32 %v2063_v19  ;;  %v2535_v19 = vld [vmem:[#allocation10] sm:$0x1] }
 0x80c   : > { %v2072_v20 = vpop.xlane.xlu1 %2071 }
 0x80d   : > { %5008 = vrcp.f32 %v2072_v20  ;;  %v2069_v55 = vpop.xlane.xlu0 %2068 }
 0x80e   : > { %5010 = vrcp.f32 %v2069_v55 }
 0x810   : > { %v2078_v21 = vpop.xlane.xlu1 %2077 }
 0x811   : > { %5012 = vrcp.f32 %v2078_v21  ;;  %v2075_v22 = vpop.xlane.xlu0 %2074 }
 0x812   : > { %v5001_v24 = vpop.eup %5000  ;;  %5014 = vrcp.f32 %v2075_v22 }
 0x813   : > { %v5003_v25 = vpop.eup %5002  ;;  %v2087_v27 = vmul.f32 %v5001_v24, %v4987_v57 }
 0x814   : > { %v2088_v32 = vmul.f32 %v5003_v25, %v4985_v28 }
 0x815   : > { %v2096_v29 = vpop.permute.xlu0 %2095  ;;  %4577 = vmatprep.mubr.msk.f32.mxu0 %vm2006_vm5, %v2087_v27 }
 0x816   : > { %v5005_v30 = vpop.eup %5004  ;;  %4575 = vmatprep.subr.msk.mxu0 %vm2121_vm6, %v2096_v29 }
 0x817   : > { %v5007_v33 = vpop.eup %5006  ;;  %4576 = vmatpush3.msk.msra.mxu0 %vm2121_vm6, %v2096_v29  ;;  %v2090_v36 = vmul.f32 %v5005_v30, %v4989_v59  ;;  %v2613_v59 = vld [vmem:[%s6434_s19 + $0x18] sm:$0xff] }
 0x818   : > { %4578 = vmatmul.mubr.msk.f32.vlgmr.msra.gmra.mxu0 %vm2006_vm5, %v2088_v32  ;;  %v2089_v34 = vmul.f32 %v5007_v33, %v4991_v60  ;;  %v2612_v60 = vld [vmem:[%s6434_s19 + $0x10] sm:$0xff] }
 0x81a   : > { %v5009_v35 = vpop.eup %5008  ;;  %4580 = vmatprep.mubr.msk.f32.mxu0 %vm2006_vm5, %v2089_v34 }
 0x81b   : > { %v5011_v37 = vpop.eup %5010  ;;  %v2092_v40 = vmul.f32 %v5009_v35, %v4993_v63  ;;  %v2385_v63 = vlaneseq  ;;  %v2774_v35 = vrot.slane %v5947_v49, 2 }
 0x81c   : > { %4581 = vmatmul.mubr.msk.f32.gmra.mxu0 %vm2006_vm5, %v2090_v36  ;;  %v2091_v38 = vmul.f32 %v5011_v37, %v4995_v1 }
 0x81d   : > { %v6031_v1 = vshrl.u32 %v2385_v63, 7  ;;  %v6033_v2 = vand.u32 127, %v2385_v63 }
 0x81e   : > { %v5013_v39 = vpop.eup %5012  ;;  %4583 = vmatprep.mubr.msk.f32.mxu0 %vm2006_vm5, %v2091_v38 }
 0x81f   : > { %v5015_v41 = vpop.eup %5014  ;;  %v2094_v43 = vmul.f32 %v5013_v39, %v4997_v5  ;;  %vm2392_vm7 = vcmp.eq.s32.totalorder %v6031_v1, %v6033_v2 }
 0x820   : > { %4584 = vmatmul.mubr.msk.f32.gmra.mxu0 %vm2006_vm5, %v2092_v40  ;;  %v2093_v42 = vmul.f32 %v5015_v41, %v4999_v6  ;;  %v4196_v4 = vsel %vm2392_vm7, 1.0, %v5461_v0  ;;  %v2387_v40 = vadd.s32 8, %v6031_v1  ;;  %v2388_v41 = vadd.s32 16, %v6031_v1 }
 0x822   : > { %4586 = vmatprep.mubr.msk.f32.mxu0 %vm2006_vm5, %v2093_v42  ;;  %vm2393_vm8 = vcmp.eq.s32.totalorder %v2387_v40, %v6033_v2  ;;  %vm2394_vm9 = vcmp.eq.s32.totalorder %v2388_v41, %v6033_v2  ;;  %v4240_v40 = vld [vmem:[%s6435_s26 + $0x40] sm:$0xff]  ;;  %v2935_v41 = vld [vmem:[#allocation13 + $0x1] sm:$0x1] }
 0x824   : > { %4587 = vmatmul.mubr.msk.f32.gmra.mxu0 %vm2006_vm5, %v2094_v43  ;;  %v4198_v43 = vsel %vm2394_vm9, 1.0, %v5461_v0 }
 0x825   : > { %4625 = vmatprep.mubr.msk.f32.mxu0 %vm1150_vm1, %v4196_v4  ;;  %v4231_v4 = vld [vmem:[%s6433_s2 + $0x48] sm:$0xff] }
 0x8d8   : > { %v4579_v45 = vpop.f32.mrf.mxu0 }
 0x8da   : > { %v2190_v46 = vpop.f32.mrf.mxu0 }
 0x8db   : > { %4597 = vmatprep.mubr.msk.f32.mxu1 %vm1150_vm1, %v2190_v46 }
 0x8dc   : > { %v4582_v48 = vpop.f32.mrf.mxu0  ;;  %4598 = vmatmul.mubr.msk.f32.vlgmr.msra.gmra.mxu1 %vm1150_vm1, %v4579_v45  ;;  %v2389_v45 = vadd.s32 24, %v6031_v1  ;;  %v4233_v1 = vld [vmem:[%s6433_s2 + $0x58] sm:$0xff] }
 0x8dd   : > { %4632 = vmatpush3.msra.mxu1 %v2534_v47  ;;  %v2690_v47 = vld [vmem:[%s6435_s26 + $0x8] sm:$0xff] }
 0x8de   : > { %v2200_v51 = vpop.f32.mrf.mxu0  ;;  %4633 = vmatprep.subr.mxu1 %v5461_v0  ;;  %vm2395_vm10 = vcmp.eq.s32.totalorder %v2389_v45, %v6033_v2  ;;  %v4232_v2 = vld [vmem:[%s6433_s2 + $0x50] sm:$0xff] }
 0x8df   : > { %4600 = vmatprep.mubr.msk.f32.mxu1 %vm1150_vm1, %v2200_v51  ;;  %4634 = vmatpush3.msra.mxu1 %v2533_v50  ;;  %v4199_v46 = vsel %vm2395_vm10, 1.0, %v5461_v0  ;;  %v2614_v50 = vld [vmem:[#allocation11] sm:$0x1] }
 0x8e0   : > { %v4585_v53 = vpop.f32.mrf.mxu0  ;;  %4601 = vmatmul.mubr.msk.f32.gmra.mxu1 %vm1150_vm1, %v4582_v48  ;;  %4635 = vmatprep.subr.mxu1 %v5461_v0  ;;  %v2689_v48 = vld [vmem:[%s6435_s26] sm:$0xff] }
 0x8e1   : > { %4636 = vmatpush3.msra.mxu1 %v2532_v52 }
 0x8e2   : > { %v2210_v28 = vpop.f32.mrf.mxu0  ;;  %4637 = vmatprep.subr.mxu1 %v5461_v0 }
 0x8e3   : > { %4603 = vmatprep.mubr.msk.f32.mxu1 %vm1150_vm1, %v2210_v28  ;;  %4638 = vmatpush3.msra.mxu1 %v2531_v54  ;;  %v4223_v28 = vld [vmem:[%s6434_s19 + $0x38] sm:$0xff] }
 0x8e4   : > { %v4588_v56 = vpop.f32.mrf.mxu0  ;;  %4604 = vmatmul.mubr.msk.f32.gmra.mxu1 %vm1150_vm1, %v4585_v53  ;;  %4642 = vmatprep.subr.mxu1 %v5461_v0 }
 0x8e6   : > { %v2220_v57 = vpop.f32.mrf.mxu0 }
 0x8e7   : > { %4606 = vmatprep.mubr.msk.f32.mxu1 %vm1150_vm1, %v2220_v57  ;;  %v2773_v57 = vld [vmem:[#allocation10 + $0x1] sm:$0x1] }
 0x8e8   : > { %4607 = vmatmul.mubr.msk.f32.gmra.mxu1 %vm1150_vm1, %v4588_v56  ;;  %v4222_v56 = vld [vmem:[%s6434_s19 + $0x30] sm:$0xff] }
 0x8e9   : > { %4639 = vmatprep.mubr.msk.f32.mxu1 %vm5462_vm0, %v5461_v0 }
 0x8ec   : > { %4640 = vmatmul.mubr.msk.f32.vlgmr.msra.gmra.mxu1 %vm1150_vm1, %v2536_v58  ;;  %v4221_v58 = vld [vmem:[%s6434_s19 + $0x28] sm:$0xff] }
 0x8ed   : > { %4650 = vmatprep.mubr.msk.f32.mxu1 %vm5462_vm0, %v5461_v0  ;;  %4643 = vmatpush3.msra.mxu1 %v2613_v59 }
 0x8ee   : > { %4644 = vmatprep.subr.mxu1 %v5461_v0 }
 0x8ef   : > { %4645 = vmatpush3.msra.mxu1 %v2612_v60 }
 0x8f0   : > { %4646 = vmatprep.subr.mxu1 %v5461_v0 }
 0x8f1   : > { %4647 = vmatpush3.msra.mxu1 %v2611_v61  ;;  %v4220_v61 = vld [vmem:[%s6434_s19 + $0x20] sm:$0xff] }
 0x8f2   : > { %4648 = vmatprep.subr.mxu1 %v5461_v0 }
 0x8f3   : > { %4649 = vmatpush3.msra.mxu1 %v2610_v62 }
 0x8f4   : > { %4664 = vmatprep.subr.mxu1 %v5461_v0 }
 0x99c   : > { %v4599_v5 = vpop.f32.mrf.mxu1 }
 0x99e   : > { %v2323_v6 = vpop.f32.mrf.mxu1 }
 0x99f   : > { %v2362_v39 = vadd.f32 %v2323_v6, %v5792_v3  ;;  %v4197_v3 = vsel %vm2393_vm8, 1.0, %v5461_v0  ;;  %v3016_v6 = vrot.slane %v5947_v49, 3 }
 0x9a0   : > { %v4602_v8 = vpop.f32.mrf.mxu1 }
 0x9a1   : > { %v2365_v33 = vadd.f32 %v4602_v8, %v5811_v14  ;;  %v2363_v14 = vadd.f32 %v4599_v5, %v5798_v7  ;;  %v2377_v42 = vadd.f32 %v4195_v16, %v2362_v39  ;;  %v2692_v7 = vld [vmem:[%s6435_s26 + $0x18] sm:$0xff]  ;;  %v4230_v5 = vld [vmem:[%s6433_s2 + $0x40] sm:$0xff]  ;;  %v4241_v39 = vld [vmem:[%s6435_s26 + $0x48] sm:$0xff] }
 0x9a2   : > { %v2333_v10 = vpop.f32.mrf.mxu1 }
 0x9a3   : > { %v2380_v36 = vadd.f32 %v4195_v16, %v2365_v33  ;;  %v2364_v37 = vadd.f32 %v2333_v10, %v5802_v9  ;;  %v2378_v9 = vadd.f32 %v4195_v16, %v2363_v14  ;;  %v3258_v14 = vrot.slane %v5947_v49, 4 }
 0x9a4   : > { %v4605_v11 = vpop.f32.mrf.mxu1 }
 0x9a5   : > { %v2367_v22 = vadd.f32 %v4605_v11, %v5828_v23  ;;  %v4216_v23 = vld [vmem:[%s6433_s2 + $0x28] sm:$0xff]  ;;  %v2379_v38 = vadd.f32 %v4195_v16, %v2364_v37  ;;  %v4245_v37 = vld [vmem:[%s6433_s2 + $0x60] sm:$0xff] }
 0x9a6   : > { %v2343_v12 = vpop.f32.mrf.mxu1 }
 0x9a7   : > { %v2382_v30 = vadd.f32 %v4195_v16, %v2367_v22  ;;  %v2366_v32 = vadd.f32 %v2343_v12, %v5816_v17  ;;  %v4215_v17 = vld [vmem:[%s6433_s2 + $0x20] sm:$0xff] }
 0x9a8   : > { %v4608_v13 = vpop.f32.mrf.mxu1 }
 0x9a9   : > { %v2369_v15 = vadd.f32 %v4608_v13, %v5846_v31  ;;  %v4218_v31 = vld [vmem:[%s6433_s2 + $0x38] sm:$0xff]  ;;  %v2381_v34 = vadd.f32 %v4195_v16, %v2366_v32 }
 0x9aa   : > { %v2353_v18 = vpop.f32.mrf.mxu1  ;;  %v4228_v13 = vld [vmem:[%s6435_s26 + $0x38] sm:$0xff] }
 0x9ab   : > { %v2384_v20 = vadd.f32 %v4195_v16, %v2369_v15  ;;  %v2368_v55 = vadd.f32 %v2353_v18, %v5834_v26  ;;  %v4217_v26 = vld [vmem:[%s6433_s2 + $0x30] sm:$0xff]  ;;  %v4225_v18 = vld [vmem:[%s6435_s26 + $0x20] sm:$0xff] }
 0x9ac   : > { %v2605_v21 = vpop.f32.mrf.mxu1  ;;  %v4227_v15 = vld [vmem:[%s6435_s26 + $0x30] sm:$0xff] }
 0x9ad   : > { %v2383_v24 = vadd.f32 %v4195_v16, %v2368_v55  ;;  %v2606_v25 = vadd.f32 %v2605_v21, %v2535_v19  ;;  %4609 = vmatprep.subr.msk.mxu0 %vm1150_vm1, %v2384_v20  ;;  %v4226_v16 = vld [vmem:[%s6435_s26 + $0x28] sm:$0xff] }
 0x9ae   : > { %4610 = vmatpush3.xpose.msk.msra.mxu0 %vm1150_vm1, %v2384_v20  ;;  %v4641_v27 = vpop.f32.mrf.mxu1  ;;  %v2854_v55 = vld [vmem:[#allocation11 + $0x1] sm:$0x1] }
 0x9af   : > { %v2609_v29 = vmax.f32 %v2606_v25, 0.0  ;;  %4611 = vmatprep.subr.msk.mxu0 %vm1150_vm1, %v2383_v24  ;;  %v4238_v27 = vld [vmem:[%s6434_s19 + $0x58] sm:$0xff] }
 0x9b1   : > { %4651 = vmatmul.mubr.msk.f32.vlgmr.msra.gmra.mxu1 %vm1150_vm1, %v2609_v29  ;;  %v4237_v29 = vld [vmem:[%s6434_s19 + $0x50] sm:$0xff] }
 0x9b2   : > { %4665 = vmatpush3.msra.mxu1 %v4218_v31  ;;  %4612 = vmatpush3.xpose.msk.msra.mxu0 %vm1150_vm1, %v2383_v24  ;;  %v3015_v31 = vld [vmem:[#allocation10 + $0x2] sm:$0x1] }
 0x9b3   : > { %4666 = vmatprep.subr.mxu1 %v5461_v0  ;;  %4613 = vmatprep.subr.msk.mxu0 %vm1150_vm1, %v2382_v30 }
 0x9b4   : > { %4667 = vmatpush3.msra.mxu1 %v4217_v26  ;;  %4672 = vmatprep.mubr.msk.f32.mxu1 %vm5462_vm0, %v5461_v0 }
 0x9b5   : > { %4668 = vmatprep.subr.mxu1 %v5461_v0 }
 0x9b6   : > { %4669 = vmatpush3.msra.mxu1 %v4216_v23  ;;  %4614 = vmatpush3.xpose.msk.msra.mxu0 %vm1150_vm1, %v2382_v30  ;;  %v4236_v30 = vld [vmem:[%s6434_s19 + $0x48] sm:$0xff]  ;;  %v4235_v23 = vld [vmem:[%s6434_s19 + $0x40] sm:$0xff] }
 0x9b7   : > { %4670 = vmatprep.subr.mxu1 %v5461_v0  ;;  %4615 = vmatprep.subr.msk.mxu0 %vm1150_vm1, %v2381_v34 }
 0x9b8   : > { %4671 = vmatpush3.msra.mxu1 %v4215_v17  ;;  %v4248_v17 = vld [vmem:[%s6433_s2 + $0x78] sm:$0xff] }
 0x9b9   : > { %4673 = vmatmul.mubr.msk.f32.vlgmr.msra.gmra.mxu1 %vm1150_vm1, %v2774_v35  ;;  %4686 = vmatprep.subr.mxu1 %v5461_v0  ;;  %v4247_v35 = vld [vmem:[%s6433_s2 + $0x70] sm:$0xff] }
 0x9ba   : > { %4616 = vmatpush3.xpose.msk.msra.mxu0 %vm1150_vm1, %v2381_v34  ;;  %4694 = vmatprep.mubr.msk.f32.mxu1 %vm5462_vm0, %v5461_v0 }
 0x9bb   : > { %4617 = vmatprep.subr.msk.mxu0 %vm1150_vm1, %v2380_v36  ;;  %4687 = vmatpush3.msra.mxu1 %v4228_v13 }
 0x9bc   : > { %4688 = vmatprep.subr.mxu1 %v5461_v0 }
 0x9bd   : > { %4689 = vmatpush3.msra.mxu1 %v4227_v15 }
 0x9be   : > { %4618 = vmatpush3.xpose.msk.msra.mxu0 %vm1150_vm1, %v2380_v36  ;;  %4690 = vmatprep.subr.mxu1 %v5461_v0  ;;  %v4246_v36 = vld [vmem:[%s6433_s2 + $0x68] sm:$0xff]  ;;  %s6439_s2 = sld [smem:[#allocation50_spill]] }
 0x9bf   : > { %4619 = vmatprep.subr.msk.mxu0 %vm1150_vm1, %v2379_v38  ;;  %4691 = vmatpush3.msra.mxu1 %v4226_v16  ;;  %v3338_v16 = vld [vmem:[#allocation11 + $0x3] sm:$0x1] }
 0x9c0   : > { %4692 = vmatprep.subr.mxu1 %v5461_v0 }
 0x9c1   : > { %4693 = vmatpush3.msra.mxu1 %v4225_v18 }
 0x9c2   : > { %4620 = vmatpush3.xpose.msk.msra.mxu0 %vm1150_vm1, %v2379_v38  ;;  %4708 = vmatprep.subr.mxu1 %v5461_v0  ;;  %v4243_v38 = vld [vmem:[%s6435_s26 + $0x58] sm:$0xff] }
 0x9c3   : > { %4621 = vmatprep.subr.msk.mxu0 %vm1150_vm1, %v2378_v9 }
 0x9c6   : > { %4622 = vmatpush3.xpose.msk.msra.mxu0 %vm1150_vm1, %v2378_v9  ;;  %v4242_v9 = vld [vmem:[%s6435_s26 + $0x50] sm:$0xff] }
 0x9c7   : > { %4623 = vmatprep.subr.msk.mxu0 %vm1150_vm1, %v2377_v42 }
 0x9ca   : > { %4624 = vmatpush3.xpose.msk.msra.mxu0 %vm1150_vm1, %v2377_v42  ;;  %v2693_v42 = vld [vmem:[#allocation13] sm:$0x1] }
 0x9cb   : > { %4653 = vmatprep.subr.mxu0 %v5461_v0 }
 0x9cd   : > { %4626 = vmatmul.mubr.msk.f32.vlgmr.msra.gmra.mxu0 %vm1150_vm1, %v4197_v3 }
 0x9ce   : > { %4654 = vmatpush3.msra.mxu0 %v2692_v7  ;;  %4628 = vmatprep.mubr.msk.f32.mxu0 %vm1150_vm1, %v4198_v43 }
 0x9cf   : > { %4655 = vmatprep.subr.mxu0 %v5461_v0 }
 0x9d0   : > { %4656 = vmatpush3.msra.mxu0 %v2691_v44 }
 0x9d1   : > { %4657 = vmatprep.subr.mxu0 %v5461_v0  ;;  %4629 = vmatmul.mubr.msk.f32.gmra.mxu0 %vm1150_vm1, %v4199_v46 }
 0x9d2   : > { %4661 = vmatprep.mubr.msk.f32.mxu0 %vm5462_vm0, %v5461_v0  ;;  %4658 = vmatpush3.msra.mxu0 %v2690_v47  ;;  %v3096_v47 = vld [vmem:[#allocation11 + $0x2] sm:$0x1] }
 0x9d3   : > { %4659 = vmatprep.subr.mxu0 %v5461_v0 }
 0x9d4   : > { %4660 = vmatpush3.msra.mxu0 %v2689_v48 }
 0x9d5   : > { %4675 = vmatprep.subr.mxu0 %v5461_v0 }
 0xa71   : > { %v2684_v51 = vpop.f32.mrf.mxu1 }
 0xa72   : > { %v2685_v52 = vadd.f32 %v2684_v51, %v2614_v50 }
 0xa73   : > { %v4652_v53 = vpop.f32.mrf.mxu1 }
 0xa74   : > { %v2688_v54 = vmax.f32 %v2685_v52, 0.0  ;;  %v4253_v53 = vld [vmem:[%s6434_s19 + $0x78] sm:$0xff] }
 0xa76   : > { %4662 = vmatmul.mubr.msk.f32.vlgmr.msra.gmra.mxu0 %vm1150_vm1, %v2688_v54  ;;  %v4252_v54 = vld [vmem:[%s6434_s19 + $0x70] sm:$0xff] }
 0xa77   : > { %4676 = vmatpush3.msra.mxu0 %v4223_v28  ;;  %4683 = vmatprep.mubr.msk.f32.mxu0 %vm5462_vm0, %v5461_v0  ;;  %v3257_v28 = vld [vmem:[#allocation10 + $0x3] sm:$0x1] }
 0xa78   : > { %4677 = vmatprep.subr.mxu0 %v5461_v0 }
 0xa79   : > { %v2843_v59 = vpop.f32.mrf.mxu1  ;;  %4678 = vmatpush3.msra.mxu0 %v4222_v56  ;;  %v4251_v56 = vld [vmem:[%s6434_s19 + $0x68] sm:$0xff] }
 0xa7a   : > { %v2844_v60 = vadd.f32 %v2843_v59, %v2773_v57  ;;  %4679 = vmatprep.subr.mxu0 %v5461_v0  ;;  %v4250_v59 = vld [vmem:[%s6434_s19 + $0x60] sm:$0xff] }
 0xa7b   : > { %v4674_v62 = vpop.f32.mrf.mxu1  ;;  %4680 = vmatpush3.msra.mxu0 %v4221_v58 }
 0xa7c   : > { %v2847_v63 = vmax.f32 %v2844_v60, 0.0  ;;  %4681 = vmatprep.subr.mxu0 %v5461_v0  ;;  %v3513_v62 = vld [vmem:[%s6436_s28 + $0x18] sm:$0xff] }
 0xa7d   : > { %4682 = vmatpush3.msra.mxu0 %v4220_v61 }
 0xa7e   : > { %4684 = vmatmul.mubr.msk.f32.vlgmr.msra.gmra.mxu0 %vm1150_vm1, %v2847_v63  ;;  %4697 = vmatprep.subr.mxu0 %v5461_v0  ;;  %v3512_v63 = vld [vmem:[%s6436_s28 + $0x10] sm:$0xff] }
 0xa7f   : > { %4698 = vmatpush3.msra.mxu0 %v4233_v1  ;;  %4705 = vmatprep.mubr.msk.f32.mxu0 %vm5462_vm0, %v5461_v0  ;;  %v3511_v1 = vld [vmem:[%s6436_s28 + $0x8] sm:$0xff] }
 0xa80   : > { %4699 = vmatprep.subr.mxu0 %v5461_v0 }
 0xa81   : > { %4700 = vmatpush3.msra.mxu0 %v4232_v2  ;;  %v3510_v2 = vld [vmem:[%s6436_s28] sm:$0xff] }
 0xa82   : > { %4701 = vmatprep.subr.mxu0 %v5461_v0 }
 0xa83   : > { %4702 = vmatpush3.msra.mxu0 %v4231_v4  ;;  %v4258_v4 = vld [vmem:[%s6435_s26 + $0x78] sm:$0xff] }
 0xa84   : > { %4703 = vmatprep.subr.mxu0 %v5461_v0 }
 0xa85   : > { %4704 = vmatpush3.msra.mxu0 %v4230_v5  ;;  %v4257_v5 = vld [vmem:[%s6435_s26 + $0x70] sm:$0xff] }
 0xa86   : > { %4706 = vmatmul.mubr.msk.f32.vlgmr.msra.gmra.mxu0 %vm1150_vm1, %v3016_v6  ;;  %4719 = vmatprep.subr.mxu0 %v5461_v0  ;;  %v4256_v6 = vld [vmem:[%s6435_s26 + $0x68] sm:$0xff] }
 0xa87   : > { %4727 = vmatprep.mubr.msk.f32.mxu0 %vm5462_vm0, %v5461_v0  ;;  %4720 = vmatpush3.msra.mxu0 %v4243_v38 }
 0xa88   : > { %4721 = vmatprep.subr.mxu0 %v5461_v0 }
 0xa89   : > { %4722 = vmatpush3.msra.mxu0 %v4242_v9  ;;  %v3590_v9 = vld [vmem:[%s6439_s2] sm:$0x1]  ;;  %s4275_s2 = sshll.u32 %s5651_s0, 9 }
 0xa8a   : > { %4723 = vmatprep.subr.mxu0 %v5461_v0  ;;  %s6241_s8 = scalar_lea.hbm %s6393_s3, %s4275_s2 }
 0xa8b   : > { %4724 = vmatpush3.msra.mxu0 %v4241_v39 }
 0xa8c   : > { %4725 = vmatprep.subr.mxu0 %v5461_v0 }
 0xa8d   : > { %v4627_v8 = vpop.f32.mrf.mxu0  ;;  %4726 = vmatpush3.msra.mxu0 %v4240_v40 }
 0xa8e   : > { %2526 = vst.msk [vmem:[%s6128_s22 + $0x8] sm:$0xff] %vm1614_vm3, %v4627_v8  ;;  %4741 = vmatprep.subr.mxu0 %v5461_v0  ;;  %v4255_v8 = vld [vmem:[%s6435_s26 + $0x60] sm:$0xff] }
 0xa8f   : > { %v2506_v10 = vpop.f32.mrf.mxu0 }
 0xa90   : > { %2525 = vst.msk [vmem:[%s6128_s22] sm:$0xff] %vm1614_vm3, %v2506_v10 }
 0xa91   : > { %v4630_v11 = vpop.f32.mrf.mxu0 }
 0xa92   : > { %2528 = vst.msk [vmem:[%s6128_s22 + $0x18] sm:$0xff] %vm1614_vm3, %v4630_v11 }
 0xa93   : > { %v2516_v12 = vpop.f32.mrf.mxu0 }
 0xa94   : > { %2527 = vst.msk [vmem:[%s6128_s22 + $0x10] sm:$0xff] %vm1614_vm3, %v2516_v12 }
 0xb36   : > { %v2763_v19 = vpop.f32.mrf.mxu0 }
 0xb37   : > { %v2764_v44 = vadd.f32 %v2763_v19, %v2693_v42 }
 0xb38   : > { %v4663_v20 = vpop.f32.mrf.mxu0 }
 0xb3e   : > { %v2924_v21 = vpop.f32.mrf.mxu0 }
 0xb3f   : > { %v2925_v22 = vadd.f32 %v2924_v21, %v2854_v55  ;;  %v3589_v21 = vld [vmem:[#allocation16 + $0x18] sm:$0xff] }
 0xb40   : > { %v4685_v24 = vpop.f32.mrf.mxu0 }
 0xb41   : > { %v2928_v25 = vmax.f32 %v2925_v22, 0.0  ;;  %v3588_v22 = vld [vmem:[#allocation16 + $0x10] sm:$0xff]  ;;  %v3514_v24 = vld [vmem:[#allocation14] sm:$0x1] }
 0xb43   : > { %4695 = vmatmul.mubr.msk.f32.vlgmr.msra.gmra.mxu1 %vm1150_vm1, %v2928_v25  ;;  %v3587_v25 = vld [vmem:[#allocation16 + $0x8] sm:$0xff] }
 0xb44   : > { %4709 = vmatpush3.msra.mxu1 %v4238_v27  ;;  %4716 = vmatprep.mubr.msk.f32.mxu1 %vm5462_vm0, %v5461_v0 }
 0xb45   : > { %4710 = vmatprep.subr.mxu1 %v5461_v0 }
 0xb46   : > { %4711 = vmatpush3.msra.mxu1 %v4237_v29  ;;  %v3085_v32 = vpop.f32.mrf.mxu0 }
 0xb47   : > { %v3086_v26 = vadd.f32 %v3085_v32, %v3015_v31  ;;  %4712 = vmatprep.subr.mxu1 %v5461_v0  ;;  %v3586_v31 = vld [vmem:[#allocation16] sm:$0xff] }
 0xb48   : > { %4713 = vmatpush3.msra.mxu1 %v4236_v30  ;;  %v4707_v33 = vpop.f32.mrf.mxu0 }
 0xb49   : > { %v3089_v34 = vmax.f32 %v3086_v26, 0.0  ;;  %4714 = vmatprep.subr.mxu1 %v5461_v0  ;;  %v3668_v26 = vld [vmem:[%s6437_s18 + $0x18] sm:$0xff]  ;;  %v3666_v33 = vld [vmem:[%s6438_s1 + $0x8] sm:$0xff]  ;;  %s6440_s18 = sshll.u32 %s5943_s15, 2 }
 0xb4a   : > { %4715 = vmatpush3.msra.mxu1 %v4235_v23  ;;  %v3667_v23 = vld [vmem:[%s6438_s1 + $0x10] sm:$0xff]  ;;  %s6231_s5 = scalar_lea.vmem [#allocation20], %s6440_s18  ;;  %s6243_s18 = scalar_lea.sflag [#allocation19], %s3750_s6 }
 0xb4b   : > { %4730 = vmatprep.subr.mxu1 %v5461_v0  ;;  %4717 = vmatmul.mubr.msk.f32.vlgmr.msra.gmra.mxu1 %vm1150_vm1, %v3089_v34  ;;  %v3665_v34 = vld [vmem:[%s6438_s1] sm:$0xff]  ;;  %s3786_s1 = sshll.u32 %s6128_s22, 4  ;;  %s5256_s22 = scalar_lea.vmem %s5255_s12, 1024  ;;  %s6236_s1 = int_to_ptr.vmem [resolvable:$true] %s3786_s1 }
 0xb4c   : > { %4731 = vmatpush3.msra.mxu1 %v4248_v17  ;;  %4738 = vmatprep.mubr.msk.f32.mxu1 %vm5462_vm0, %v5461_v0  ;;  %v3419_v17 = vld [vmem:[#allocation13 + $0x3] sm:$0x1]  ;;  %s5250_s9 = scalar_lea.vmem %s6236_s1, 512  ;;  %p5257_p13 = scmp.lt.s32.totalorder %s6236_s1, %s5255_s12 }
 0xb4d   : > { %4732 = vmatprep.subr.mxu1 %v5461_v0  ;;  %p5251_p1 = scmp.ne.s32.totalorder %s6236_s1, %s5250_s9  ;;  %p5258_p7 = scmp.lt.s32.totalorder %s5256_s22, %s5250_s9 }
 0xb4e   : > { %4733 = vmatpush3.msra.mxu1 %v4247_v35 }
 0xb4f   : > { %4734 = vmatprep.subr.mxu1 %v5461_v0  ;;  %p5252_p3 = pnand %p5251_p1, %p6441_p2  ;;  %p5259_p8 = por %p5258_p7, %p5257_p13 }
 0xb50   : > { %4735 = vmatpush3.msra.mxu1 %v4246_v36 }
 0xb51   : > { %4736 = vmatprep.subr.mxu1 %v5461_v0  ;;  %p5253_p4 = pneg %p5252_p3 }
 0xb52   : > { %4737 = vmatpush3.msra.mxu1 %v4245_v37 }
 0xb53   : > { %4739 = vmatmul.mubr.msk.f32.vlgmr.msra.gmra.mxu1 %vm1150_vm1, %v3258_v14  ;;  %4752 = vmatprep.subr.mxu1 %v5461_v0  ;;  %p5260_p9 = pnand %p5259_p8, %p5253_p4 }
 0xb54   : > { %4760 = vmatprep.mubr.msk.f32.mxu1 %vm5462_vm0, %v5461_v0  ;;  %4753 = vmatpush3.msra.mxu1 %v4258_v4 }
 0xb55   : > { %4754 = vmatprep.subr.mxu1 %v5461_v0 }
 0xb56   : > { %4755 = vmatpush3.msra.mxu1 %v4257_v5 }
 0xb57   : > { %4756 = vmatprep.subr.mxu1 %v5461_v0 }
 0xb58   : > { %4757 = vmatpush3.msra.mxu1 %v4256_v6 }
 0xb59   : > { %4758 = vmatprep.subr.mxu1 %v5461_v0 }
 0xb5a   : > { %4759 = vmatpush3.msra.mxu1 %v4255_v8 }
 0xb5b   : > { %4774 = vmatprep.subr.mxu1 %v5461_v0 }
 0xc03   : > { %v3005_v3 = vpop.f32.mrf.mxu1 }
 0xc04   : > { %v3006_v7 = vadd.f32 %v3005_v3, %v2935_v41 }
 0xc05   : > { %v4696_v43 = vpop.f32.mrf.mxu1 }
 0xc06   : > { %v3494_v45 = vrot.slane %v3006_v7, 7 }
 0xc08   : > { %v3503_v46 = vsel %vm3502_vm11, %v2764_v44, %v3494_v45 }
 0xc0b   : > { %v3166_v48 = vpop.f32.mrf.mxu1 }
 0xc0c   : > { %v3167_v50 = vadd.f32 %v3166_v48, %v3096_v47 }
 0xc0d   : > { %v4718_v51 = vpop.f32.mrf.mxu1 }
 0xc0e   : > { %v3170_v52 = vmax.f32 %v3167_v50, 0.0 }
 0xc10   : > { %4728 = vmatmul.mubr.msk.f32.vlgmr.msra.gmra.mxu0 %vm1150_vm1, %v3170_v52 }
 0xc11   : > { %4742 = vmatpush3.msra.mxu0 %v4253_v53  ;;  %4749 = vmatprep.mubr.msk.f32.mxu0 %vm5462_vm0, %v5461_v0 }
 0xc12   : > { %4743 = vmatprep.subr.mxu0 %v5461_v0 }
 0xc13   : > { %v3327_v57 = vpop.f32.mrf.mxu1  ;;  %4744 = vmatpush3.msra.mxu0 %v4252_v54 }
 0xc14   : > { %v3328_v58 = vadd.f32 %v3327_v57, %v3257_v28  ;;  %4745 = vmatprep.subr.mxu0 %v5461_v0 }
 0xc15   : > { %v4740_v60 = vpop.f32.mrf.mxu1  ;;  %4746 = vmatpush3.msra.mxu0 %v4251_v56 }
 0xc16   : > { %v3331_v61 = vmax.f32 %v3328_v58, 0.0  ;;  %4747 = vmatprep.subr.mxu0 %v5461_v0 }
 0xc17   : > { %4748 = vmatpush3.msra.mxu0 %v4250_v59 }
 0xc18   : > { %4750 = vmatmul.mubr.msk.f32.vlgmr.msra.gmra.mxu0 %vm1150_vm1, %v3331_v61  ;;  %4763 = vmatprep.subr.mxu0 %v5461_v0 }
 0xc19   : > { %4764 = vmatpush3.msra.mxu0 %v3513_v62  ;;  %4771 = vmatprep.mubr.msk.f32.mxu0 %vm5462_vm0, %v5461_v0 }
 0xc1a   : > { %4765 = vmatprep.subr.mxu0 %v5461_v0 }
 0xc1b   : > { %4766 = vmatpush3.msra.mxu0 %v3512_v63 }
 0xc1c   : > { %4767 = vmatprep.subr.mxu0 %v5461_v0 }
 0xc1d   : > { %4768 = vmatpush3.msra.mxu0 %v3511_v1 }
 0xc1e   : > { %4769 = vmatprep.subr.mxu0 %v5461_v0 }
 0xc1f   : > { %4770 = vmatpush3.msra.mxu0 %v3510_v2 }
 0xc20   : > { %4772 = vmatmul.mubr.msk.f32.vlgmr.msra.gmra.mxu0 %vm1150_vm1, %v5947_v49  ;;  %4785 = vmatprep.subr.mxu0 %v5461_v0  ;;  %v3177_v49 = vld [vmem:[#allocation13 + $0x2] sm:$0x1] }
 0xc21   : > { %4793 = vmatprep.mubr.msk.f32.mxu0 %vm5462_vm0, %v5461_v0  ;;  %4786 = vmatpush3.msra.mxu0 %v3668_v26 }
 0xc22   : > { %4787 = vmatprep.subr.mxu0 %v5461_v0 }
 0xc23   : > { %4788 = vmatpush3.msra.mxu0 %v3667_v23 }
 0xc24   : > { %4789 = vmatprep.subr.mxu0 %v5461_v0 }
 0xc25   : > { %4790 = vmatpush3.msra.mxu0 %v3666_v33 }
 0xc26   : > { %4791 = vmatprep.subr.mxu0 %v5461_v0 }
 0xc27   : > { %4792 = vmatpush3.msra.mxu0 %v3665_v34 }
 0xcd0   : > { %v3247_v10 = vpop.f32.mrf.mxu0 }
 0xcd1   : > { %v3248_v11 = vadd.f32 %v3247_v10, %v3177_v49 }
 0xcd2   : > { %v4729_v12 = vpop.f32.mrf.mxu0 }
 0xcd3   : > { %v3497_v13 = vrot.slane %v3248_v11, 6 }
 0xcd5   : > { %v3505_v15 = vsel %vm3504_vm12, %v3503_v46, %v3497_v13 }
 0xcd8   : > { %v3408_v18 = vpop.f32.mrf.mxu0 }
 0xcd9   : > { %v3409_v19 = vadd.f32 %v3408_v18, %v3338_v16 }
 0xcda   : > { %v4751_v20 = vpop.f32.mrf.mxu0 }
 0xcdb   : > { %v3412_v55 = vmax.f32 %v3409_v19, 0.0 }
 0xcdd   : > { %4761 = vmatmul.mubr.msk.f32.vlgmr.msra.gmra.mxu1 %vm1150_vm1, %v3412_v55 }
 0xcde   : > { %4775 = vmatpush3.msra.mxu1 %v3589_v21  ;;  %4782 = vmatprep.mubr.msk.f32.mxu1 %vm5462_vm0, %v5461_v0 }
 0xcdf   : > { %4776 = vmatprep.subr.mxu1 %v5461_v0 }
 0xce0   : > { %v3581_v27 = vpop.f32.mrf.mxu0  ;;  %4777 = vmatpush3.msra.mxu1 %v3588_v22 }
 0xce1   : > { %v3582_v29 = vadd.f32 %v3581_v27, %v3514_v24  ;;  %4778 = vmatprep.subr.mxu1 %v5461_v0 }
 0xce2   : > { %v4773_v30 = vpop.f32.mrf.mxu0  ;;  %4779 = vmatpush3.msra.mxu1 %v3587_v25 }
 0xce3   : > { %v3585_v32 = vmax.f32 %v3582_v29, 0.0  ;;  %4780 = vmatprep.subr.mxu1 %v5461_v0 }
 0xce4   : > { %4781 = vmatpush3.msra.mxu1 %v3586_v31 }
 0xce5   : > { %4783 = vmatmul.mubr.msk.f32.vlgmr.msra.gmra.mxu1 %vm1150_vm1, %v3585_v32 }
 0xd9d   : > { %v3489_v35 = vpop.f32.mrf.mxu1 }
 0xd9e   : > { %v3490_v36 = vadd.f32 %v3489_v35, %v3419_v17 }
 0xd9f   : > { %v4762_v37 = vpop.f32.mrf.mxu1 }
 0xda0   : > { %v3500_v14 = vrot.slane %v3490_v36, 5 }
 0xda2   : > { %v3507_v38 = vsel %vm3506_vm13, %v3505_v15, %v3500_v14 }
 0xda3   : > { %3509 = vst.msk [vmem:[%s6231_s5] sm:$0xf] %vm3508_vm14, %v3507_v38 }
 0xda5   : > { %v3660_v0 = vpop.f32.mrf.mxu1 }
 0xda6   : > { %v3661_v39 = vadd.f32 %v3660_v0, %v3590_v9 }
 0xda7   : > { %v4784_v40 = vpop.f32.mrf.mxu1 }
 0xda8   : > { %v3664_v41 = vmax.f32 %v3661_v39, 0.0 }
 0xdaa   : > { %4794 = vmatmul.mubr.msk.f32.vlgmr.msra.gmra.mxu0 %vm1150_vm1, %v3664_v41 }
 0xdab   : > { %5263 = shalt.err (!%p5260_p9)
}
 0xdac   : > { %s5264_s6 = scalar_lea.hbm %s6241_s8, 512  ;;  %s5268_s2 = scalar_lea.hbm %s6393_s3, 1024 }
 0xdad   : > { %p5265_p12 = scmp.ne.s32.totalorder %s6241_s8, %s5264_s6  ;;  %p5269_p6 = scmp.lt.s32.totalorder %s6241_s8, %s6393_s3 }
 0xdae   : > { %p5270_p10 = scmp.lt.s32.totalorder %s5268_s2, %s5264_s6 }
 0xdaf   : > { %p5266_p11 = pnand %p5265_p12, %p6441_p2 }
 0xdb0   : > { %p5271_p0 = por %p5270_p10, %p5269_p6 }
 0xdb1   : > { %p5267_p5 = pneg %p5266_p11 }
 0xdb3   : > { %p5272_p1 = pnand %p5271_p0, %p5267_p5 }
 0xdb5   : > { %5275 = shalt.err (!%p5272_p1)
}
 0xdb6   : > { %s5465_s9 = smov 128   ;;  %s5466_s12 = smov 8  }
 0xdb7   : > { %4833 = dma.vmem_to_hbm [thread:$0]  (%p6441_p2), %s6236_s1, 512, %s6241_s8, %s6243_s18, %s5465_s9, %s5465_s9, %s5466_s12  }
 0xdb8   : > { %s4266_s10 = sshll.u32 %s5651_s0, 6  ;;  %s3773_s6 = sshll.u32 %s5953_s11, 4  ;;  %s3774_s6 = int_to_ptr.vmem [resolvable:$true] %s3773_s6 }
 0xdb9   : > { %s6264_s22 = scalar_lea.hbm %s5613_s29, %s4266_s10  ;;  %s6268_s2 = scalar_lea.hbm %s5623_s4, %s4266_s10 }
 0xdba   : > { %s3746_s3 = scalar_lea.sflag [#allocation4], %s5943_s15  ;;  %s5276_s13 = scalar_lea.vmem %s3774_s6, 64 }
 0xdbb   : > { %p5277_p3 = scmp.ne.s32.totalorder %s3774_s6, %s5276_s13  ;;  %s5467_s14 = smov [#allocation17]  }
 0xdbc   : > { %s5280_s17 = sshll.u32 %s5467_s14, 4  ;;  %s5281_s17 = int_to_ptr.vmem [resolvable:$false] %s5280_s17 }
 0xdbd   : > { %p5278_p4 = pnand %p5277_p3, %p6441_p2  ;;  %s5282_s19 = scalar_lea.vmem %s5281_s17, 128 }
 0xdbe   : > { %p5283_p7 = scmp.lt.s32.totalorder %s3774_s6, %s5281_s17  ;;  %p5284_p8 = scmp.lt.s32.totalorder %s5282_s19, %s5276_s13 }
 0xdbf   : > { %p5279_p13 = pneg %p5278_p4 }
 0xdc0   : > { %p5285_p9 = por %p5284_p8, %p5283_p7 }
 0xdc2   : > { %p5286_p12 = pnand %p5285_p9, %p5279_p13 }
 0xdc4   : > { %5289 = shalt.err (!%p5286_p12)
}
 0xdc5   : > { %s5290_s8 = scalar_lea.hbm %s6264_s22, 64  ;;  %s5294_s1 = scalar_lea.hbm %s5613_s29, 128 }
 0xdc6   : > { %p5291_p11 = scmp.ne.s32.totalorder %s6264_s22, %s5290_s8  ;;  %p5295_p10 = scmp.lt.s32.totalorder %s6264_s22, %s5613_s29 }
 0xdc7   : > { %p5296_p0 = scmp.lt.s32.totalorder %s5294_s1, %s5290_s8 }
 0xdc8   : > { %p5292_p5 = pnand %p5291_p11, %p6441_p2 }
 0xdc9   : > { %p5297_p1 = por %p5296_p0, %p5295_p10 }
 0xdca   : > { %p5293_p6 = pneg %p5292_p5 }
 0xdcc   : > { %p5298_p3 = pnand %p5297_p1, %p5293_p6 }
 0xdce   : > { %5301 = shalt.err (!%p5298_p3)
}
 0xdcf   : > { %4832 = dma.vmem_to_hbm [thread:$0]  (%p6441_p2), %s3774_s6, 64, %s6264_s22, %s3746_s3  }
 0xdd0   : > { %s3802_s13 = sshll.u32 %s6231_s5, 4  ;;  %s5468_s14 = smov [#allocation20]   ;;  %s3803_s13 = int_to_ptr.vmem [resolvable:$true] %s3802_s13 }
 0xdd1   : > { %s5302_s17 = scalar_lea.vmem %s3803_s13, 64  ;;  %s5306_s11 = sshll.u32 %s5468_s14, 4  ;;  %s5307_s11 = int_to_ptr.vmem [resolvable:$false] %s5306_s11 }
 0xdd2   : > { %p5303_p4 = scmp.ne.s32.totalorder %s3803_s13, %s5302_s17  ;;  %s5308_s19 = scalar_lea.vmem %s5307_s11, 128 }
 0xdd3   : > { %p5309_p8 = scmp.lt.s32.totalorder %s3803_s13, %s5307_s11  ;;  %p5310_p9 = scmp.lt.s32.totalorder %s5308_s19, %s5302_s17 }
 0xdd4   : > { %p5304_p13 = pnand %p5303_p4, %p6441_p2 }
 0xdd5   : > { %p5311_p12 = por %p5310_p9, %p5309_p8 }
 0xdd6   : > { %p5305_p7 = pneg %p5304_p13 }
 0xdd8   : > { %p5312_p11 = pnand %p5311_p12, %p5305_p7 }
 0xdda   : > { %5315 = shalt.err (!%p5312_p11)
}
 0xddb   : > { %s5316_s5 = scalar_lea.hbm %s6268_s2, 64  ;;  %s5320_s3 = scalar_lea.hbm %s5623_s4, 128 }
 0xddc   : > { %p5317_p5 = scmp.ne.s32.totalorder %s6268_s2, %s5316_s5  ;;  %p5321_p0 = scmp.lt.s32.totalorder %s6268_s2, %s5623_s4 }
 0xddd   : > { %p5322_p1 = scmp.lt.s32.totalorder %s5320_s3, %s5316_s5 }
 0xdde   : > { %p5318_p6 = pnand %p5317_p5, %p6441_p2 }
 0xddf   : > { %p5323_p3 = por %p5322_p1, %p5321_p0 }
 0xde0   : > { %p5319_p10 = pneg %p5318_p6 }
 0xde2   : > { %p5324_p4 = pnand %p5323_p3, %p5319_p10 }
 0xde4   : > { %5327 = shalt.err (!%p5324_p4)
}
 0xde5   : > { %s6442_s9 = sld [smem:[#allocation52_spill]]  ;;  %s4270_s12 = sshll.u32 %s5651_s0, 4  ;;  %vm3743_vm15 = vcmask 24576  }
 0xde6   : > { %4834 = dma.vmem_to_hbm [thread:$0]  (%p6441_p2), %s3803_s13, 64, %s6268_s2, %s6243_s18  }
 0xde7   : > { %s1099_s10 = scalar_lea.vmem [#allocation21], %s5943_s15  ;;  %s6301_s6 = scalar_lea.hbm %s5628_s21, %s4270_s12 }
 0xde8   : > { %s3815_s22 = sshll.u32 %s1099_s10, 4  ;;  %s3761_s8 = scalar_lea.sflag [#allocation22], %s5943_s15  ;;  %s3816_s22 = int_to_ptr.vmem [resolvable:$true] %s3815_s22 }
 0xde9   : > { %s5328_s1 = scalar_lea.vmem %s3816_s22, 16  ;;  %s5469_s17 = smov [#allocation21]  }
 0xdea   : > { %p5329_p13 = scmp.ne.s32.totalorder %s3816_s22, %s5328_s1  ;;  %s5332_s18 = sshll.u32 %s5469_s17, 4  ;;  %s5333_s18 = int_to_ptr.vmem [resolvable:$false] %s5332_s18 }
 0xdeb   : > { %v3669_v42 = vld [vmem:[%s6442_s9] sm:$0x1]  ;;  %s5334_s0 = scalar_lea.vmem %s5333_s18, 32  ;;  %p5335_p9 = scmp.lt.s32.totalorder %s3816_s22, %s5333_s18 }
 0xdec   : > { %p5330_p7 = pnand %p5329_p13, %p6441_p2  ;;  %p5336_p12 = scmp.lt.s32.totalorder %s5334_s0, %s5328_s1 }
 0xdee   : > { %p5331_p8 = pneg %p5330_p7  ;;  %p5337_p11 = por %p5336_p12, %p5335_p9 }
 0xdf0   : > { %p5338_p5 = pnand %p5337_p11, %p5331_p8 }
 0xe6a   : > { %v3739_v3 = vpop.f32.mrf.mxu0 }
 0xe6b   : > { %v3740_v7 = vadd.f32 %v3739_v3, %v3669_v42 }
 0xe6c   : > { %v4795_v43 = vpop.f32.mrf.mxu0 }
 0xe6d   : > { %3744 = vst.msk [vmem:[%s1099_s10] sm:$0x1] %vm3743_vm15, %v3740_v7 }
 0xe6e   : > { %5341 = shalt.err (!%p5338_p5)
}
 0xe6f   : > { %s5342_s15 = scalar_lea.hbm %s6301_s6, 16  ;;  %s5346_s2 = scalar_lea.hbm %s5628_s21, 32 }
 0xe70   : > { %p5343_p6 = scmp.ne.s32.totalorder %s6301_s6, %s5342_s15  ;;  %p5347_p1 = scmp.lt.s32.totalorder %s6301_s6, %s5628_s21 }
 0xe71   : > { %p5348_p3 = scmp.lt.s32.totalorder %s5346_s2, %s5342_s15 }
 0xe72   : > { %p5344_p10 = pnand %p5343_p6, %p6441_p2 }
 0xe73   : > { %p5349_p4 = por %p5348_p3, %p5347_p1 }
 0xe74   : > { %p5345_p0 = pneg %p5344_p10 }
 0xe76   : > { %p5350_p13 = pnand %p5349_p4, %p5345_p0 }
 0xe78   : > { %5353 = shalt.err (!%p5350_p13)
}
 0xe79   : > { %4835 = dma.vmem_to_hbm [thread:$0]  (%p6441_p2), %s3816_s22, 16, %s6301_s6, %s3761_s8  }
 0xe7a PF: > { %s6443_s13 = sld [smem:[#allocation56_spill]] }
 0xe7b   : > { %s6444_s14 = sld [smem:[#allocation54_spill]] }
 0xe7c   : > { %s6445_s11 = sld [smem:[#allocation59_spill]] }
 0xe80   : > { %p4899_p7 = scmp.ge.s32.totalorder %s6443_s13, 2 }
 0xe81   : > { %s3827_s19 = sand.u32 1, %s6444_s14  }
 0xe82   : > { %p6446_p8 = scmp.ne.s32.totalorder %s6445_s11, 0  ;;  %s3828_s5 = scalar_lea.sflag [#allocation4], %s3827_s19 }
 0xe84   : > { %p4869_p9 = pnand %p4899_p7, %p6446_p8 }
 0xe86   : > { %p4870_p12 = pneg %p4869_p9 }
 0xe88   : > { %5391 = dma.done.wait (%p4870_p12), %s3828_s5, 64  }
 0xe89   : > { %5393 = vsyncadd (%p4870_p12), %s3828_s5, 4294967232  ;;  %s6447_s3 = sadd.s32 4294967294, %s6443_s13  }
 0xe8a   : > { %s3836_s9 = sand.u32 1, %s6447_s3  }
 0xe8b   : > { %s3837_s12 = scalar_lea.sflag [#allocation19], %s3836_s9 }
 0xe8c   : > { %5395 = dma.done.wait (%p4870_p12), %s3837_s12, 576  }
 0xe8d   : > { %5397 = vsyncadd (%p4870_p12), %s3837_s12, 4294966720  ;;  %s3855_s7 = scalar_lea.sflag [#allocation22], %s3827_s19 }
 0xe8e   : > { %5399 = dma.done.wait (%p4870_p12), %s3855_s7, 16  }
 0xe8f   : > { %5401 = vsyncadd (%p4870_p12), %s3855_s7, 4294967280  ;;  %s6448_s22 = sld [smem:[#allocation57_spill]]  ;;  %s6451_s15 = smov %s5408_s16 }
 0xe90   : > { %s6449_s10 = sld [smem:[#allocation55_spill]] }
 0xe91   : > { %s6450_s18 = sld [smem:[#allocation58_spill]] }
 0xe95   : > { %p83_p2 = scmp.ge.s32.totalorder %s6448_s22, 4  }
 0xe96   : > { %s6452_s16 = smov %s6449_s10 }
 0xe97   :  { %85 = sbr.rel (!%p83_p2) target bundleno = 69 (0x45), region = 303 }
 0xe9c   :  { %3859 = vsyncpa [#allocation3], 1 }
 0xe9d   :  { %3861 = vsyncpa [#allocation3 + $0x1], 1 }
 0xe9e   :  { %3862 = vsyncpa [#allocation6], 1 }
 0xe9f   :  { %3863 = vsyncpa [#allocation9], 1 }
 0xea0   :  { %3864 = vsyncpa [#allocation12], 1 }
 0xea1   :  { %3865 = vsyncpa [#allocation15], 1 }
 0xea2   :  { %3866 = vsyncpa [#allocation4], 1 }
 0xea3   :  { %3868 = vsyncpa [#allocation4 + $0x1], 1 }
 0xea4   :  { %3869 = vsyncpa [#allocation19], 1 }
 0xea5   :  { %3871 = vsyncpa [#allocation19 + $0x1], 1 }
 0xea6   :  { %3872 = vsyncpa [#allocation22], 1 }
 0xea7   :  { %3874 = vsyncpa [#allocation22 + $0x1], 1 }

</bundles_post_ra>
